<compile_context>
chip_gen: v7x
topology: tpu7x:2x2x1
jax: 0.10.0
libtpu: 0.0.40
codegen_flags: <defaults>
</compile_context>

<pallas_src>
import functools
import math

import jax
import jax.numpy as jnp
from jax import lax
from jax.experimental import pallas as pl
from jax.experimental.pallas import tpu as pltpu


def _round_up(x, m):
    return ((x + m - 1) // m) * m


def _conv3x3s2_kernel(xe_ref, xo_ref, xh_ref, w01_ref, w2_ref, b_ref,
                      o_ref, acc_ref):
    """One (batch, output-row band) block of Conv2d(C, C, 3, stride=2, pad=1).

    Padded-input lane-interleaved pair view (built free in the wrapper):
      out[ho, wo] taps:
        kw=0 -> lanes [0:Cp]   of col-pair wo
        kw=1 -> lanes [Cp:2Cp] of col-pair wo
        kw=2 -> lanes [0:Cp]   of col-pair wo+1
        kh=0 -> even row of row-pair ho        (xe_ref)
        kh=1 -> odd  row of row-pair ho        (xo_ref)
        kh=2 -> even row of row-pair ho+1      (xe_ref shifted / xh_ref halo)

    xe_ref : (th, P, 2Cp)  even rows of row-pairs [ho0, ho0+th)
    xo_ref : (th, P, 2Cp)  odd  rows of row-pairs [ho0, ho0+th)
    xh_ref : (P, 2Cp)      even row of row-pair ho0+th   (kh=2 halo)
    w01_ref: (3, 2Cp, Cp)  [W[kh,0]; W[kh,1]] stacked along ci
    w2_ref : (3, Cp, Cp)   W[kh,2]
    b_ref  : (1, Cp)
    o_ref  : (th, WOk, Cp)
    acc_ref: (th*WOk, Cp)  f32 VMEM scratch accumulator
    """
    th, wok, cp = o_ref.shape

    def taps(rows_full, rows_shift, kh):
        # kw in {0,1} folded into one K=2*Cp dot; kw=2 is a K=Cp dot.
        a = jnp.dot(rows_full.reshape(-1, 2 * cp), w01_ref[kh],
                    preferred_element_type=jnp.float32)
        b = jnp.dot(rows_shift.reshape(-1, cp), w2_ref[kh],
                    preferred_element_type=jnp.float32)
        return a + b

    # kh = 0 (even input rows) -- bias folded into the first write.
    acc_ref[...] = (taps(xe_ref[:, :wok, :], xe_ref[:, 1:, :cp], 0)
                    + b_ref[...].astype(jnp.float32))
    # kh = 1 (odd input rows)
    acc_ref[...] += taps(xo_ref[:, :wok, :], xo_ref[:, 1:, :cp], 1)
    # kh = 2 (even rows, one row-pair down): band-internal rows + halo row.
    if th > 1:
        acc_ref[pl.ds(0, (th - 1) * wok), :] += taps(
            xe_ref[1:, :wok, :], xe_ref[1:, 1:, :cp], 2)
    acc_ref[pl.ds((th - 1) * wok, wok), :] += taps(
        xh_ref[:wok, :], xh_ref[1:, :cp], 2)

    o_ref[...] = acc_ref[...].reshape(th, wok, cp).astype(o_ref.dtype)


def _pick_band_rows(ho, p, wok, cp, in_isz, out_isz, budget):
    """Largest output-row band height fitting the VMEM budget."""
    fixed = (2 * p * 2 * cp * in_isz          # halo block (double-buffered)
             + 2 * 9 * cp * cp * in_isz       # w01 + w2  (double-buffered)
             + 2 * 2 * cp * 4)                # bias
    per_row = (2 * 2 * p * 2 * cp * in_isz    # xe + xo blocks (double-buffered)
               + 2 * wok * cp * out_isz       # output block   (double-buffered)
               + 6 * wok * cp * 4             # acc scratch + f32 dot results
               + 3 * wok * 2 * cp * in_isz)   # loaded LHS value slices
    avail = max(budget - fixed, per_row)
    return max(1, min(ho, int(avail // per_row)))


def downsample_forward(x, weight_ochw, bias, *, compute_dtype=None,
                       out_dtype=None, channels_last=False,
                       vmem_budget_bytes=None, vmem_limit_bytes=None):
    """Equivalent of Downsample.forward: Conv2d(dim, dim, 3, stride=2, pad=1).

    x:           (N, C, H, W) (or (N, H, W, C) if channels_last=True)
    weight_ochw: (C, C, 3, 3)  PyTorch layout (out, in, kh, kw)
    bias:        (C,)
    compute_dtype: operand dtype for the MXU (e.g. jnp.bfloat16); accumulation
                   is always f32.  None keeps the input dtype (f32 reference).
    out_dtype:   kernel output dtype (default: x.dtype).
    """
    if channels_last:
        x_nhwc = x
    else:
        x_nhwc = jnp.transpose(x, (0, 2, 3, 1))
    n, h, w, c = x_nhwc.shape
    ho, wo = (h + 1) // 2, (w + 1) // 2

    cp = _round_up(c, 128)        # lane-dense channels (unmasked vst, full MXU)
    wok = _round_up(wo, 8)        # sublane-aligned output width
    p = wok + 1                   # col-pairs needed per row (incl. kw=2 halo)
    wp = 2 * p

    in_dtype = compute_dtype if compute_dtype is not None else x_nhwc.dtype
    out_dt = out_dtype if out_dtype is not None else x_nhwc.dtype
    in_isz = jnp.dtype(in_dtype).itemsize
    out_isz = jnp.dtype(out_dt).itemsize

    # Per-generation VMEM budget: 128 MiB on v5e/v6e, 64 MiB per TC on v7x.
    try:
        vmem_cap = int(pltpu.get_tpu_info().vmem_capacity_bytes)
    except Exception:
        vmem_cap = 64 * 1024 * 1024   # conservative fallback (v7x-safe)
    if vmem_budget_bytes is None:
        vmem_budget_bytes = int(vmem_cap * 0.60)
    if vmem_limit_bytes is None:
        vmem_limit_bytes = int(vmem_cap * 0.85)

    th = _pick_band_rows(ho, p, wok, cp, in_isz, out_isz, vmem_budget_bytes)
    # Keep both TensorCores busy on v7x: ensure >= 2 parallel grid blocks.
    if n == 1 and th >= ho and ho >= 2:
        th = (ho + 1) // 2
    n_hb = -(-ho // th)
    ho_pad = n_hb * th
    hp2 = ho_pad + 1              # row-pairs (last one only feeds the kh=2 halo)
    hp = 2 * hp2

    # ---- glue: pad once, then a FREE bitcast-reshape to the pair view ----
    # TODO(synk): accept NHWC end-to-end in the surrounding model and fold the
    # zero-pad into in-kernel masking to reach exactly 1x-in / 1x-out HBM.
    xpad = jnp.pad(x_nhwc.astype(in_dtype),
                   ((0, 0), (1, hp - 1 - h), (1, wp - 1 - w), (0, cp - c)))
    xpr = xpad.reshape(n, hp2, 2, p, 2 * cp)   # (batch, row-pair, parity, col-pair, 2Cp)

    # weight (co, ci, kh, kw) -> (kh, kw, ci, co), pad channels, fold kw.
    w_t = jnp.transpose(weight_ochw, (2, 3, 1, 0))
    w_t = jnp.pad(w_t, ((0, 0), (0, 0), (0, cp - c), (0, cp - c)))
    w01 = jnp.concatenate([w_t[:, 0], w_t[:, 1]], axis=1).astype(in_dtype)  # (3,2Cp,Cp)
    w2 = w_t[:, 2].astype(in_dtype)                                         # (3,Cp,Cp)
    b2 = jnp.pad(bias, (0, cp - c)).reshape(1, cp).astype(jnp.float32)

    # TODO(synk): for very large C (>= ~512 on v7x) add a K grid axis over ci
    # chunks (f32 VMEM accumulator, axis "arbitrary") so the weights need not
    # be fully VMEM-resident.

    flops = 2 * n * ho_pad * wok * 9 * cp * cp
    bytes_accessed = int(in_isz * (xpr.size + n * n_hb * p * 2 * cp
                                   + w01.size + w2.size)
                         + 4 * b2.size + out_isz * n * ho_pad * wok * cp)

    out = pl.pallas_call(
        _conv3x3s2_kernel,
        out_shape=jax.ShapeDtypeStruct((n, ho_pad, wok, cp), out_dt),
        grid=(n, n_hb),
        in_specs=[
            # even rows of the band's row-pairs
            pl.BlockSpec((None, th, None, p, 2 * cp),
                         lambda ni, ti: (ni, ti, 0, 0, 0)),
            # odd rows of the band's row-pairs
            pl.BlockSpec((None, th, None, p, 2 * cp),
                         lambda ni, ti: (ni, ti, 1, 0, 0)),
            # kh=2 halo: even row of the next row-pair
            pl.BlockSpec((None, None, None, p, 2 * cp),
                         lambda ni, ti: (ni, (ti + 1) * th, 0, 0, 0)),
            # weights + bias: VMEM-resident across the grid
            pl.BlockSpec((3, 2 * cp, cp), lambda ni, ti: (0, 0, 0)),
            pl.BlockSpec((3, cp, cp), lambda ni, ti: (0, 0, 0)),
            pl.BlockSpec((1, cp), lambda ni, ti: (0, 0)),
        ],
        out_specs=pl.BlockSpec((None, th, wok, cp),
                               lambda ni, ti: (ni, ti, 0, 0)),
        scratch_shapes=[pltpu.VMEM((th * wok, cp), jnp.float32)],
        compiler_params=pltpu.CompilerParams(
            dimension_semantics=("parallel", "parallel"),
            vmem_limit_bytes=vmem_limit_bytes),
        cost_estimate=pl.CostEstimate(flops=flops, transcendentals=0,
                                      bytes_accessed=bytes_accessed),
    )(xpr, xpr, xpr, w01, w2, b2)

    out = out[:, :ho, :wo, :c]
    if not channels_last:
        out = jnp.transpose(out, (0, 3, 1, 2))
    return out


if __name__ == "__main__":
    key = jax.random.PRNGKey(0)
    k_x, k_w, k_b = jax.random.split(key, 3)

    N, C, H, W = 2, 4, 16, 16
    x = jax.random.normal(k_x, (N, C, H, W), dtype=jnp.float32)
    # Deterministic synthetic Conv2d(dim, dim, 3, 2, 1) parameters.
    fan_in = C * 3 * 3
    bound = 1.0 / math.sqrt(fan_in)
    weight = jax.random.uniform(k_w, (C, C, 3, 3), jnp.float32, -bound, bound)
    bias = jax.random.uniform(k_b, (C,), jnp.float32, -bound, bound)

    # Reference: XLA conv (NHWC / HWIO), stride 2, pad 1.
    x_nhwc = jnp.transpose(x, (0, 2, 3, 1))
    w_hwio = jnp.transpose(weight, (2, 3, 1, 0))
    ref = lax.conv_general_dilated(
        x_nhwc, w_hwio, window_strides=(2, 2), padding=((1, 1), (1, 1)),
        dimension_numbers=("NHWC", "HWIO", "NHWC")) + bias
    ref = jnp.transpose(ref, (0, 3, 1, 2))

    # f32 reference path (matches PyTorch numerics).
    fwd = jax.jit(downsample_forward)
    out = jax.block_until_ready(fwd(x, weight, bias))
    assert out.shape == (N, C, (H + 1) // 2, (W + 1) // 2), out.shape
    assert jnp.allclose(out, ref, atol=1e-4, rtol=1e-4), "f32 mismatch vs reference conv"

    # bf16 operand fast path (the perf default for v5e/v6e/v7x); f32 accumulation.
    fwd_bf16 = jax.jit(functools.partial(downsample_forward,
                                         compute_dtype=jnp.bfloat16))
    out_bf16 = jax.block_until_ready(fwd_bf16(x, weight, bias))
    assert out_bf16.shape == out.shape
    assert jnp.allclose(out_bf16, ref, atol=3e-2, rtol=3e-2), "bf16 mismatch vs reference conv"

    print("KERNEL_OK")
</pallas_src>

<mosaic_0001>
module attributes {stable_mosaic.version = 11 : i64} {
  func.func @_conv3x3s2_kernel(%arg0: i32, %arg1: i32, %arg2: memref<1x8x1x9x256xf32, #tpu.memory_space<vmem>>, %arg3: memref<1x8x1x9x256xf32, #tpu.memory_space<vmem>>, %arg4: memref<1x1x1x9x256xf32, #tpu.memory_space<vmem>>, %arg5: memref<3x256x128xf32, #tpu.memory_space<vmem>>, %arg6: memref<3x128x128xf32, #tpu.memory_space<vmem>>, %arg7: memref<1x128xf32, #tpu.memory_space<vmem>>, %arg8: memref<1x8x8x128xf32, #tpu.memory_space<vmem>>, %arg9: memref<64x128xf32, #tpu.memory_space<vmem>>) attributes {dimension_semantics = [#tpu.dimension_semantics<parallel>, #tpu.dimension_semantics<parallel>], iteration_bounds = array<i64: 2, 1>, scalar_prefetch = 0 : i64, scratch_operands = 1 : i64, tpu.core_type = #tpu.core_type<tc>, window_params = [{transform_indices = @transform_0, window_bounds = array<i64: 1, 8, 1, 9, 256>}, {transform_indices = @transform_1, window_bounds = array<i64: 1, 8, 1, 9, 256>}, {transform_indices = @transform_2, window_bounds = array<i64: 1, 1, 1, 9, 256>}, {pipeline_mode = #tpu.pipeline_mode<synchronous>, transform_indices = @transform_3, window_bounds = array<i64: 3, 256, 128>}, {pipeline_mode = #tpu.pipeline_mode<synchronous>, transform_indices = @transform_4, window_bounds = array<i64: 3, 128, 128>}, {pipeline_mode = #tpu.pipeline_mode<synchronous>, transform_indices = @transform_5, window_bounds = array<i64: 1, 128>}, {transform_indices = @transform_6, window_bounds = array<i64: 1, 8, 8, 128>}]} {
    %c0 = arith.constant 0 : index
    %c0_0 = arith.constant 0 : index
    %c0_1 = arith.constant 0 : index
    %c0_2 = arith.constant 0 : index
    %c0_3 = arith.constant 0 : index
    %0 = vector.load %arg2[%c0, %c0_0, %c0_1, %c0_2, %c0_3] : memref<1x8x1x9x256xf32, #tpu.memory_space<vmem>>, vector<1x8x1x8x256xf32>
    %1 = vector.shape_cast %0 : vector<1x8x1x8x256xf32> to vector<8x8x256xf32>
    %c0_4 = arith.constant 0 : index
    %c0_5 = arith.constant 0 : index
    %c0_6 = arith.constant 0 : index
    %c1 = arith.constant 1 : index
    %c0_7 = arith.constant 0 : index
    %2 = vector.load %arg2[%c0_4, %c0_5, %c0_6, %c1, %c0_7] : memref<1x8x1x9x256xf32, #tpu.memory_space<vmem>>, vector<1x8x1x8x128xf32>
    %3 = vector.shape_cast %2 : vector<1x8x1x8x128xf32> to vector<8x8x128xf32>
    %4 = vector.shape_cast %1 : vector<8x8x256xf32> to vector<64x256xf32>
    %c0_8 = arith.constant 0 : index
    %c0_9 = arith.constant 0 : index
    %c0_10 = arith.constant 0 : index
    %5 = vector.load %arg5[%c0_8, %c0_9, %c0_10] : memref<3x256x128xf32, #tpu.memory_space<vmem>>, vector<1x256x128xf32>
    %6 = vector.shape_cast %5 : vector<1x256x128xf32> to vector<256x128xf32>
    %cst = arith.constant dense<0.000000e+00> : vector<64x128xf32>
    %7 = tpu.matmul %4, %6, %cst {dimension_numbers = #tpu.dot_dimension_numbers<[1], [0], [0], [1], [0, 0, 1, 1], [], []>} : vector<64x256xf32>, vector<256x128xf32>, vector<64x128xf32> -> vector<64x128xf32>
    %8 = vector.shape_cast %3 : vector<8x8x128xf32> to vector<64x128xf32>
    %c0_11 = arith.constant 0 : index
    %c0_12 = arith.constant 0 : index
    %c0_13 = arith.constant 0 : index
    %9 = vector.load %arg6[%c0_11, %c0_12, %c0_13] : memref<3x128x128xf32, #tpu.memory_space<vmem>>, vector<1x128x128xf32>
    %10 = vector.shape_cast %9 : vector<1x128x128xf32> to vector<128x128xf32>
    %cst_14 = arith.constant dense<0.000000e+00> : vector<64x128xf32>
    %11 = tpu.matmul %8, %10, %cst_14 {dimension_numbers = #tpu.dot_dimension_numbers<[1], [0], [0], [1], [0, 0, 1, 1], [], []>} : vector<64x128xf32>, vector<128x128xf32>, vector<64x128xf32> -> vector<64x128xf32>
    %12 = arith.addf %7, %11 : vector<64x128xf32>
    %c0_15 = arith.constant 0 : index
    %c0_16 = arith.constant 0 : index
    %13 = vector.load %arg7[%c0_15, %c0_16] : memref<1x128xf32, #tpu.memory_space<vmem>>, vector<1x128xf32>
    %14 = vector.broadcast %13 : vector<1x128xf32> to vector<64x128xf32>
    %15 = arith.addf %12, %14 : vector<64x128xf32>
    %c0_17 = arith.constant 0 : index
    %c0_18 = arith.constant 0 : index
    %16 = vector.load %arg9[%c0_17, %c0_18] : memref<64x128xf32, #tpu.memory_space<vmem>>, vector<64x128xf32>
    tpu.vector_store %arg9[%c0_17, %c0_18], %15 {strides = array<i32>} : memref<64x128xf32, #tpu.memory_space<vmem>>, vector<64x128xf32>,
    %c0_19 = arith.constant 0 : index
    %c0_20 = arith.constant 0 : index
    %17 = vector.load %arg9[%c0_19, %c0_20] : memref<64x128xf32, #tpu.memory_space<vmem>>, vector<64x128xf32>
    %c0_21 = arith.constant 0 : index
    %c0_22 = arith.constant 0 : index
    %c0_23 = arith.constant 0 : index
    %c0_24 = arith.constant 0 : index
    %c0_25 = arith.constant 0 : index
    %18 = vector.load %arg3[%c0_21, %c0_22, %c0_23, %c0_24, %c0_25] : memref<1x8x1x9x256xf32, #tpu.memory_space<vmem>>, vector<1x8x1x8x256xf32>
    %19 = vector.shape_cast %18 : vector<1x8x1x8x256xf32> to vector<8x8x256xf32>
    %c0_26 = arith.constant 0 : index
    %c0_27 = arith.constant 0 : index
    %c0_28 = arith.constant 0 : index
    %c1_29 = arith.constant 1 : index
    %c0_30 = arith.constant 0 : index
    %20 = vector.load %arg3[%c0_26, %c0_27, %c0_28, %c1_29, %c0_30] : memref<1x8x1x9x256xf32, #tpu.memory_space<vmem>>, vector<1x8x1x8x128xf32>
    %21 = vector.shape_cast %20 : vector<1x8x1x8x128xf32> to vector<8x8x128xf32>
    %22 = vector.shape_cast %19 : vector<8x8x256xf32> to vector<64x256xf32>
    %c1_31 = arith.constant 1 : index
    %c0_32 = arith.constant 0 : index
    %c0_33 = arith.constant 0 : index
    %23 = vector.load %arg5[%c1_31, %c0_32, %c0_33] : memref<3x256x128xf32, #tpu.memory_space<vmem>>, vector<1x256x128xf32>
    %24 = vector.shape_cast %23 : vector<1x256x128xf32> to vector<256x128xf32>
    %cst_34 = arith.constant dense<0.000000e+00> : vector<64x128xf32>
    %25 = tpu.matmul %22, %24, %cst_34 {dimension_numbers = #tpu.dot_dimension_numbers<[1], [0], [0], [1], [0, 0, 1, 1], [], []>} : vector<64x256xf32>, vector<256x128xf32>, vector<64x128xf32> -> vector<64x128xf32>
    %26 = vector.shape_cast %21 : vector<8x8x128xf32> to vector<64x128xf32>
    %c1_35 = arith.constant 1 : index
    %c0_36 = arith.constant 0 : index
    %c0_37 = arith.constant 0 : index
    %27 = vector.load %arg6[%c1_35, %c0_36, %c0_37] : memref<3x128x128xf32, #tpu.memory_space<vmem>>, vector<1x128x128xf32>
    %28 = vector.shape_cast %27 : vector<1x128x128xf32> to vector<128x128xf32>
    %cst_38 = arith.constant dense<0.000000e+00> : vector<64x128xf32>
    %29 = tpu.matmul %26, %28, %cst_38 {dimension_numbers = #tpu.dot_dimension_numbers<[1], [0], [0], [1], [0, 0, 1, 1], [], []>} : vector<64x128xf32>, vector<128x128xf32>, vector<64x128xf32> -> vector<64x128xf32>
    %30 = arith.addf %25, %29 : vector<64x128xf32>
    %31 = arith.addf %17, %30 : vector<64x128xf32>
    %c0_39 = arith.constant 0 : index
    %c0_40 = arith.constant 0 : index
    %32 = vector.load %arg9[%c0_39, %c0_40] : memref<64x128xf32, #tpu.memory_space<vmem>>, vector<64x128xf32>
    tpu.vector_store %arg9[%c0_39, %c0_40], %31 {strides = array<i32>} : memref<64x128xf32, #tpu.memory_space<vmem>>, vector<64x128xf32>,
    %c0_41 = arith.constant 0 : index
    %c0_42 = arith.constant 0 : index
    %33 = vector.load %arg9[%c0_41, %c0_42] : memref<64x128xf32, #tpu.memory_space<vmem>>, vector<56x128xf32>
    %c0_43 = arith.constant 0 : index
    %c1_44 = arith.constant 1 : index
    %c0_45 = arith.constant 0 : index
    %c0_46 = arith.constant 0 : index
    %c0_47 = arith.constant 0 : index
    %34 = vector.load %arg2[%c0_43, %c1_44, %c0_45, %c0_46, %c0_47] : memref<1x8x1x9x256xf32, #tpu.memory_space<vmem>>, vector<1x7x1x8x256xf32>
    %35 = vector.shape_cast %34 : vector<1x7x1x8x256xf32> to vector<7x8x256xf32>
    %c0_48 = arith.constant 0 : index
    %c1_49 = arith.constant 1 : index
    %c0_50 = arith.constant 0 : index
    %c1_51 = arith.constant 1 : index
    %c0_52 = arith.constant 0 : index
    %36 = vector.load %arg2[%c0_48, %c1_49, %c0_50, %c1_51, %c0_52] : memref<1x8x1x9x256xf32, #tpu.memory_space<vmem>>, vector<1x7x1x8x128xf32>
    %37 = vector.shape_cast %36 : vector<1x7x1x8x128xf32> to vector<7x8x128xf32>
    %38 = vector.shape_cast %35 : vector<7x8x256xf32> to vector<56x256xf32>
    %c2 = arith.constant 2 : index
    %c0_53 = arith.constant 0 : index
    %c0_54 = arith.constant 0 : index
    %39 = vector.load %arg5[%c2, %c0_53, %c0_54] : memref<3x256x128xf32, #tpu.memory_space<vmem>>, vector<1x256x128xf32>
    %40 = vector.shape_cast %39 : vector<1x256x128xf32> to vector<256x128xf32>
    %cst_55 = arith.constant dense<0.000000e+00> : vector<56x128xf32>
    %41 = tpu.matmul %38, %40, %cst_55 {dimension_numbers = #tpu.dot_dimension_numbers<[1], [0], [0], [1], [0, 0, 1, 1], [], []>} : vector<56x256xf32>, vector<256x128xf32>, vector<56x128xf32> -> vector<56x128xf32>
    %42 = vector.shape_cast %37 : vector<7x8x128xf32> to vector<56x128xf32>
    %c2_56 = arith.constant 2 : index
    %c0_57 = arith.constant 0 : index
    %c0_58 = arith.constant 0 : index
    %43 = vector.load %arg6[%c2_56, %c0_57, %c0_58] : memref<3x128x128xf32, #tpu.memory_space<vmem>>, vector<1x128x128xf32>
    %44 = vector.shape_cast %43 : vector<1x128x128xf32> to vector<128x128xf32>
    %cst_59 = arith.constant dense<0.000000e+00> : vector<56x128xf32>
    %45 = tpu.matmul %42, %44, %cst_59 {dimension_numbers = #tpu.dot_dimension_numbers<[1], [0], [0], [1], [0, 0, 1, 1], [], []>} : vector<56x128xf32>, vector<128x128xf32>, vector<56x128xf32> -> vector<56x128xf32>
    %46 = arith.addf %41, %45 : vector<56x128xf32>
    %47 = arith.addf %33, %46 : vector<56x128xf32>
    %c0_60 = arith.constant 0 : index
    %c0_61 = arith.constant 0 : index
    %48 = vector.load %arg9[%c0_60, %c0_61] : memref<64x128xf32, #tpu.memory_space<vmem>>, vector<56x128xf32>
    tpu.vector_store %arg9[%c0_60, %c0_61], %47 {strides = array<i32>} : memref<64x128xf32, #tpu.memory_space<vmem>>, vector<56x128xf32>,
    %c56 = arith.constant 56 : index
    %c0_62 = arith.constant 0 : index
    %49 = vector.load %arg9[%c56, %c0_62] : memref<64x128xf32, #tpu.memory_space<vmem>>, vector<8x128xf32>
    %c0_63 = arith.constant 0 : index
    %c0_64 = arith.constant 0 : index
    %c0_65 = arith.constant 0 : index
    %c0_66 = arith.constant 0 : index
    %c0_67 = arith.constant 0 : index
    %50 = vector.load %arg4[%c0_63, %c0_64, %c0_65, %c0_66, %c0_67] : memref<1x1x1x9x256xf32, #tpu.memory_space<vmem>>, vector<1x1x1x8x256xf32>
    %51 = vector.shape_cast %50 : vector<1x1x1x8x256xf32> to vector<8x256xf32>
    %c0_68 = arith.constant 0 : index
    %c0_69 = arith.constant 0 : index
    %c0_70 = arith.constant 0 : index
    %c1_71 = arith.constant 1 : index
    %c0_72 = arith.constant 0 : index
    %52 = vector.load %arg4[%c0_68, %c0_69, %c0_70, %c1_71, %c0_72] : memref<1x1x1x9x256xf32, #tpu.memory_space<vmem>>, vector<1x1x1x8x128xf32>
    %53 = vector.shape_cast %52 : vector<1x1x1x8x128xf32> to vector<8x128xf32>
    %c2_73 = arith.constant 2 : index
    %c0_74 = arith.constant 0 : index
    %c0_75 = arith.constant 0 : index
    %54 = vector.load %arg5[%c2_73, %c0_74, %c0_75] : memref<3x256x128xf32, #tpu.memory_space<vmem>>, vector<1x256x128xf32>
    %55 = vector.shape_cast %54 : vector<1x256x128xf32> to vector<256x128xf32>
    %cst_76 = arith.constant dense<0.000000e+00> : vector<8x128xf32>
    %56 = tpu.matmul %51, %55, %cst_76 {dimension_numbers = #tpu.dot_dimension_numbers<[1], [0], [0], [1], [0, 0, 1, 1], [], []>} : vector<8x256xf32>, vector<256x128xf32>, vector<8x128xf32> -> vector<8x128xf32>
    %c2_77 = arith.constant 2 : index
    %c0_78 = arith.constant 0 : index
    %c0_79 = arith.constant 0 : index
    %57 = vector.load %arg6[%c2_77, %c0_78, %c0_79] : memref<3x128x128xf32, #tpu.memory_space<vmem>>, vector<1x128x128xf32>
    %58 = vector.shape_cast %57 : vector<1x128x128xf32> to vector<128x128xf32>
    %cst_80 = arith.constant dense<0.000000e+00> : vector<8x128xf32>
    %59 = tpu.matmul %53, %58, %cst_80 {dimension_numbers = #tpu.dot_dimension_numbers<[1], [0], [0], [1], [0, 0, 1, 1], [], []>} : vector<8x128xf32>, vector<128x128xf32>, vector<8x128xf32> -> vector<8x128xf32>
    %60 = arith.addf %56, %59 : vector<8x128xf32>
    %61 = arith.addf %49, %60 : vector<8x128xf32>
    %c56_81 = arith.constant 56 : index
    %c0_82 = arith.constant 0 : index
    %62 = vector.load %arg9[%c56_81, %c0_82] : memref<64x128xf32, #tpu.memory_space<vmem>>, vector<8x128xf32>
    tpu.vector_store %arg9[%c56_81, %c0_82], %61 {strides = array<i32>} : memref<64x128xf32, #tpu.memory_space<vmem>>, vector<8x128xf32>,
    %c0_83 = arith.constant 0 : index
    %c0_84 = arith.constant 0 : index
    %63 = vector.load %arg9[%c0_83, %c0_84] : memref<64x128xf32, #tpu.memory_space<vmem>>, vector<64x128xf32>
    %64 = vector.shape_cast %63 : vector<64x128xf32> to vector<8x8x128xf32>
    %c0_85 = arith.constant 0 : index
    %c0_86 = arith.constant 0 : index
    %c0_87 = arith.constant 0 : index
    %c0_88 = arith.constant 0 : index
    %65 = vector.load %arg8[%c0_85, %c0_86, %c0_87, %c0_88] : memref<1x8x8x128xf32, #tpu.memory_space<vmem>>, vector<1x8x8x128xf32>
    %66 = vector.shape_cast %65 : vector<1x8x8x128xf32> to vector<8x8x128xf32>
    %67 = vector.shape_cast %64 : vector<8x8x128xf32> to vector<1x8x8x128xf32>
    tpu.vector_store %arg8[%c0_85, %c0_86, %c0_87, %c0_88], %67 {strides = array<i32>} : memref<1x8x8x128xf32, #tpu.memory_space<vmem>>, vector<1x8x8x128xf32>,
    return
  }
  func.func @transform_0(%arg0: i32, %arg1: i32) -> (i32, i32, i32, i32, i32) {
    %c0_i32 = arith.constant 0 : i32
    %c0_i32_0 = arith.constant 0 : i32
    %c0_i32_1 = arith.constant 0 : i32
    %c0_i32_2 = arith.constant 0 : i32
    return %arg0, %arg1, %c0_i32, %c0_i32_0, %c0_i32_1 : i32, i32, i32, i32, i32
  }
  func.func @transform_1(%arg0: i32, %arg1: i32) -> (i32, i32, i32, i32, i32) {
    %c1_i32 = arith.constant 1 : i32
    %c0_i32 = arith.constant 0 : i32
    %c0_i32_0 = arith.constant 0 : i32
    %c0_i32_1 = arith.constant 0 : i32
    return %arg0, %arg1, %c1_i32, %c0_i32, %c0_i32_0 : i32, i32, i32, i32, i32
  }
  func.func @transform_2(%arg0: i32, %arg1: i32) -> (i32, i32, i32, i32, i32) {
    %c1_i32 = arith.constant 1 : i32
    %0 = arith.addi %arg1, %c1_i32 : i32
    %c8_i32 = arith.constant 8 : i32
    %1 = arith.muli %0, %c8_i32 : i32
    %c0_i32 = arith.constant 0 : i32
    %c0_i32_0 = arith.constant 0 : i32
    %c0_i32_1 = arith.constant 0 : i32
    %c0_i32_2 = arith.constant 0 : i32
    return %arg0, %1, %c0_i32, %c0_i32_0, %c0_i32_1 : i32, i32, i32, i32, i32
  }
  func.func @transform_3(%arg0: i32, %arg1: i32) -> (i32, i32, i32) {
    %c0_i32 = arith.constant 0 : i32
    %c0_i32_0 = arith.constant 0 : i32
    %c0_i32_1 = arith.constant 0 : i32
    %c0_i32_2 = arith.constant 0 : i32
    return %c0_i32, %c0_i32_0, %c0_i32_1 : i32, i32, i32
  }
  func.func @transform_4(%arg0: i32, %arg1: i32) -> (i32, i32, i32) {
    %c0_i32 = arith.constant 0 : i32
    %c0_i32_0 = arith.constant 0 : i32
    %c0_i32_1 = arith.constant 0 : i32
    %c0_i32_2 = arith.constant 0 : i32
    return %c0_i32, %c0_i32_0, %c0_i32_1 : i32, i32, i32
  }
  func.func @transform_5(%arg0: i32, %arg1: i32) -> (i32, i32) {
    %c0_i32 = arith.constant 0 : i32
    %c0_i32_0 = arith.constant 0 : i32
    %c0_i32_1 = arith.constant 0 : i32
    return %c0_i32, %c0_i32_0 : i32, i32
  }
  func.func @transform_6(%arg0: i32, %arg1: i32) -> (i32, i32, i32, i32) {
    %c0_i32 = arith.constant 0 : i32
    %c0_i32_0 = arith.constant 0 : i32
    %c0_i32_1 = arith.constant 0 : i32
    return %arg0, %arg1, %c0_i32, %c0_i32_0 : i32, i32, i32, i32
  }
}

</mosaic_0001>

<bundles_post_ra>
// kernel: downsample_forward.1
= control target key start
LH: loop header
LB: loop body
LE: loop exit
PB: predicated region body
PF: predicated region fallthrough
CT: control target
= control target key end

     0   :  { %s3299_s21 = smov 0   ;;  %s3301_s22 = smov 0   ;;  %s4348_s0 = inlined_call_operand.vmem [shape: f32[2,9,2,9,256], index: 0, kind: input, shape index: {}, may-alias: {0,1,2}]   ;;  %s4349_s1 = inlined_call_operand.vmem [shape: f32[2,9,2,9,256], index: 1, kind: input, shape index: {}, may-alias: {0,1,2}]   ;;  %s4350_s2 = inlined_call_operand.vmem [shape: f32[2,9,2,9,256], index: 2, kind: input, shape index: {}, may-alias: {0,1,2}]   ;;  %s4351_s3 = inlined_call_operand.vmem [shape: f32[3,256,128], index: 3, kind: input, shape index: {}]   ;;  %s4352_s4 = inlined_call_operand.vmem [shape: f32[3,128,128], index: 4, kind: input, shape index: {}]   ;;  %s4353_s5 = inlined_call_operand.vmem [shape: f32[1,128], index: 5, kind: input, shape index: {}]   ;;  %s4354_s6 = inlined_call_operand.vmem [shape: f32[2,8,8,128], index: 6, kind: output, shape index: {}]  }
   0x1   :  { %s3303_s23 = smov 0   ;;  %s3305_s24 = smov 0  }
   0x2   :  { %s3307_s25 = smov 0  }
   0x3 LB: > { %s28_s26 = sadd.s32 1, %s3243_s24  ;;  %p44_p1 = scmp.ne.s32.totalorder %s3235_s22, %s3231_s21  ;;  %s3247_s25 = sphi %s3307_s25, %s16_s25   ;;  %s3243_s24 = sphi %s3305_s24, %s4361_s24   ;;  %s3239_s23 = sphi %s3303_s23, %s4360_s23   ;;  %s3235_s22 = sphi %s3301_s22, %s4359_s22   ;;  %s3231_s21 = sphi %s3299_s21, %s4358_s21  }
   0x4   : > { %p30_p0 = scmp.ge.s32.totalorder %s28_s26, 2  ;;  %p45_p2 = scmp.eq.s32.totalorder %s3247_s25, 0 }
   0x5   : > { %s37_s29 = sadd.s32 1, %s3235_s22  ;;  %p2124_p5 = scmp.ge.s32.totalorder %s3247_s25, 2 }
   0x6   : > { %s4363_s26 = smov (%p30_p0, %s28_s26), 0  ;;  %p3330_p3 = por %p45_p2, %p44_p1 }
   0x7   : > { %s32_s28 = ssub.s32 %s3243_s24, %s4363_s26  ;;  %230 = sbr.rel (%p2124_p5) target bundleno = 62 (0x3e), region = 28 }
   0x8   : > { %p35_p4 = scmp.eq.s32.totalorder %s32_s28, 0 }
   0xa   : > { %s3338_s30 = scalar_select %p35_p4, %s3235_s22, %s37_s29  }
   0xe   : > { %233 = sbr.rel (!%p3330_p3) target bundleno = 38 (0x26), region = 32  ;;  %s235_s7 = sand.u32 (%p3330_p3), 1, %s3235_s22  }
   0xf   : > { %s3067_s8 = smul.u32 (%p3330_p3), 576, %s3243_s24  ;;  %s2125_s9 = sshll.u32 (%p3330_p3), %s235_s7, 8 }
  0x10   : > { %s3350_s13 = scalar_lea.vmem (%p3330_p3), [#allocation3], %s2125_s9   ;;  %s3352_s14 = smov (%p3330_p3), 0  }
  0x11   : > { %s3348_s12 = scalar_lea.vmem (%p3330_p3), %s4348_s0, %s3067_s8  }
  0x15 LB: >> { %v266_v0 = vld [vmem:[%s3348_s12] sm:$0xff]  ;;  %v282_v8 = vld [vmem:[%s3348_s12 + $0x8] sm:$0xff]  ;;  %v298_v16 = vld [vmem:[%s3348_s12 + $0x10] sm:$0xff]  ;;  %s260_s14 = sadd.s32 1, %s3251_s14   ;;  %s3251_s14 = sphi %s3352_s14, %s260_s14  }
  0x16   : >> { %v268_v1 = vld [vmem:[%s3348_s12 + $0x40] sm:$0xff]  ;;  %267 = vst [vmem:[%s3350_s13] sm:$0xff] %v266_v0  ;;  %283 = vst [vmem:[%s3350_s13 + $0x8] sm:$0xff] %v282_v8  ;;  %v284_v9 = vld [vmem:[%s3348_s12 + $0x48] sm:$0xff]  ;;  %p259_p6 = scmp.ge.s32.totalorder %s260_s14, 1 }
  0x17   : >> { %v270_v2 = vld [vmem:[%s3348_s12 + $0x80] sm:$0xff]  ;;  %269 = vst [vmem:[%s3350_s13 + $0x20] sm:$0xff] %v268_v1  ;;  %v286_v10 = vld [vmem:[%s3348_s12 + $0x88] sm:$0xff]  ;;  %285 = vst [vmem:[%s3350_s13 + $0x28] sm:$0xff] %v284_v9 }
  0x18   : >> { %271 = vst [vmem:[%s3350_s13 + $0x40] sm:$0xff] %v270_v2  ;;  %v272_v3 = vld [vmem:[%s3348_s12 + $0xc0] sm:$0xff]  ;;  %v288_v11 = vld [vmem:[%s3348_s12 + $0xc8] sm:$0xff]  ;;  %287 = vst [vmem:[%s3350_s13 + $0x48] sm:$0xff] %v286_v10 }
  0x19   : >> { %v274_v4 = vld [vmem:[%s3348_s12 + $0x100] sm:$0xff]  ;;  %273 = vst [vmem:[%s3350_s13 + $0x60] sm:$0xff] %v272_v3  ;;  %289 = vst [vmem:[%s3350_s13 + $0x68] sm:$0xff] %v288_v11  ;;  %v290_v12 = vld [vmem:[%s3348_s12 + $0x108] sm:$0xff] }
  0x1a   : >> { %v276_v5 = vld [vmem:[%s3348_s12 + $0x140] sm:$0xff]  ;;  %275 = vst [vmem:[%s3350_s13 + $0x80] sm:$0xff] %v274_v4  ;;  %v292_v13 = vld [vmem:[%s3348_s12 + $0x148] sm:$0xff]  ;;  %291 = vst [vmem:[%s3350_s13 + $0x88] sm:$0xff] %v290_v12 }
  0x1b   : >> { %277 = vst [vmem:[%s3350_s13 + $0xa0] sm:$0xff] %v276_v5  ;;  %v278_v6 = vld [vmem:[%s3348_s12 + $0x180] sm:$0xff]  ;;  %v294_v14 = vld [vmem:[%s3348_s12 + $0x188] sm:$0xff]  ;;  %293 = vst [vmem:[%s3350_s13 + $0xa8] sm:$0xff] %v292_v13 }
  0x1c   : >> { %v280_v7 = vld [vmem:[%s3348_s12 + $0x1c0] sm:$0xff]  ;;  %279 = vst [vmem:[%s3350_s13 + $0xc0] sm:$0xff] %v278_v6  ;;  %295 = vst [vmem:[%s3350_s13 + $0xc8] sm:$0xff] %v294_v14  ;;  %v296_v15 = vld [vmem:[%s3348_s12 + $0x1c8] sm:$0xff] }
  0x1d   : >> { %281 = vst [vmem:[%s3350_s13 + $0xe0] sm:$0xff] %v280_v7  ;;  %v300_v17 = vld [vmem:[%s3348_s12 + $0x50] sm:$0xff]  ;;  %297 = vst [vmem:[%s3350_s13 + $0xe8] sm:$0xff] %v296_v15  ;;  %v314_v24 = vld [vmem:[%s3348_s12 + $0x18] sm:$0xff] }
  0x1e   : >> { %299 = vst [vmem:[%s3350_s13 + $0x10] sm:$0xff] %v298_v16  ;;  %301 = vst [vmem:[%s3350_s13 + $0x30] sm:$0xff] %v300_v17  ;;  %v302_v18 = vld [vmem:[%s3348_s12 + $0x90] sm:$0xff]  ;;  %v316_v25 = vld [vmem:[%s3348_s12 + $0x58] sm:$0xff] }
  0x1f   : >> { %v304_v19 = vld [vmem:[%s3348_s12 + $0xd0] sm:$0xff]  ;;  %303 = vst [vmem:[%s3350_s13 + $0x50] sm:$0xff] %v302_v18  ;;  %v318_v26 = vld [vmem:[%s3348_s12 + $0x98] sm:$0xff]  ;;  %315 = vst [vmem:[%s3350_s13 + $0x18] sm:$0xff] %v314_v24  ;;  %262 = sbr.rel (!%p259_p6) target bundleno = 21 (0x15), region = 159 }
  0x20   : >> { %v306_v20 = vld [vmem:[%s3348_s12 + $0x110] sm:$0xff]  ;;  %305 = vst [vmem:[%s3350_s13 + $0x70] sm:$0xff] %v304_v19  ;;  %317 = vst [vmem:[%s3350_s13 + $0x38] sm:$0xff] %v316_v25  ;;  %v320_v27 = vld [vmem:[%s3348_s12 + $0xd8] sm:$0xff] }
  0x21   : >> { %307 = vst [vmem:[%s3350_s13 + $0x90] sm:$0xff] %v306_v20  ;;  %v308_v21 = vld [vmem:[%s3348_s12 + $0x150] sm:$0xff]  ;;  %319 = vst [vmem:[%s3350_s13 + $0x58] sm:$0xff] %v318_v26  ;;  %v322_v28 = vld [vmem:[%s3348_s12 + $0x118] sm:$0xff] }
  0x22   : >> { %v310_v22 = vld [vmem:[%s3348_s12 + $0x190] sm:$0xff]  ;;  %309 = vst [vmem:[%s3350_s13 + $0xb0] sm:$0xff] %v308_v21  ;;  %v324_v29 = vld [vmem:[%s3348_s12 + $0x158] sm:$0xff]  ;;  %321 = vst [vmem:[%s3350_s13 + $0x78] sm:$0xff] %v320_v27 }
  0x23   : >> { %v312_v23 = vld [vmem:[%s3348_s12 + $0x1d0] sm:$0xff]  ;;  %311 = vst [vmem:[%s3350_s13 + $0xd0] sm:$0xff] %v310_v22  ;;  %323 = vst [vmem:[%s3350_s13 + $0x98] sm:$0xff] %v322_v28  ;;  %v326_v30 = vld [vmem:[%s3348_s12 + $0x198] sm:$0xff] }
  0x24   : >> { %313 = vst [vmem:[%s3350_s13 + $0xf0] sm:$0xff] %v312_v23  ;;  %325 = vst [vmem:[%s3350_s13 + $0xb8] sm:$0xff] %v324_v29  ;;  %v328_v31 = vld [vmem:[%s3348_s12 + $0x1d8] sm:$0xff] }
  0x25   : >> { %327 = vst [vmem:[%s3350_s13 + $0xd8] sm:$0xff] %v326_v30  ;;  %329 = vst [vmem:[%s3350_s13 + $0xf8] sm:$0xff] %v328_v31 }
  0x26 PF: > { %373 = sbr.rel (!%p3330_p3) target bundleno = 62 (0x3e), region = 62  ;;  %s375_s15 = sand.u32 (%p3330_p3), 1, %s3235_s22  }
  0x27   : > { %s2136_s16 = smul.u32 (%p3330_p3), 576, %s3243_s24  ;;  %s2135_s17 = sshll.u32 (%p3330_p3), %s375_s15, 8 }
  0x28   : > { %s3434_s29 = scalar_lea.vmem (%p3330_p3), [#allocation4], %s2135_s17   ;;  %s3440_s27 = smov (%p3330_p3), 0  }
  0x29   : > { %s3431_s20 = scalar_lea.vmem (%p3330_p3), %s4349_s1, %s2136_s16 }
  0x2a   : > { %s1969_s28 = scalar_lea.vmem (%p3330_p3), %s3431_s20, 32  }
  0x2b   : > { %s4356_s7 = smov (%p3330_p3), %s1969_s28 }
  0x2d LB: >> { %v407_v32 = vld [vmem:[%s3255_s7] sm:$0xff]  ;;  %v423_v40 = vld [vmem:[%s3255_s7 + $0x8] sm:$0xff]  ;;  %v439_v48 = vld [vmem:[%s3255_s7 + $0x10] sm:$0xff]  ;;  %s401_s27 = sadd.s32 1, %s3259_s27   ;;  %s3259_s27 = sphi %s3440_s27, %s401_s27   ;;  %s3255_s7 = sphi %s4356_s7, %s4357_s7  }
  0x2e   : >> { %v409_v33 = vld [vmem:[%s3255_s7 + $0x40] sm:$0xff]  ;;  %408 = vst [vmem:[%s3434_s29] sm:$0xff] %v407_v32  ;;  %424 = vst [vmem:[%s3434_s29 + $0x8] sm:$0xff] %v423_v40  ;;  %v425_v41 = vld [vmem:[%s3255_s7 + $0x48] sm:$0xff]  ;;  %p400_p7 = scmp.ge.s32.totalorder %s401_s27, 1 }
  0x2f   : >> { %v411_v34 = vld [vmem:[%s3255_s7 + $0x80] sm:$0xff]  ;;  %410 = vst [vmem:[%s3434_s29 + $0x20] sm:$0xff] %v409_v33  ;;  %v427_v42 = vld [vmem:[%s3255_s7 + $0x88] sm:$0xff]  ;;  %426 = vst [vmem:[%s3434_s29 + $0x28] sm:$0xff] %v425_v41 }
  0x30   : >> { %412 = vst [vmem:[%s3434_s29 + $0x40] sm:$0xff] %v411_v34  ;;  %v413_v35 = vld [vmem:[%s3255_s7 + $0xc0] sm:$0xff]  ;;  %v429_v43 = vld [vmem:[%s3255_s7 + $0xc8] sm:$0xff]  ;;  %428 = vst [vmem:[%s3434_s29 + $0x48] sm:$0xff] %v427_v42 }
  0x31   : >> { %v415_v36 = vld [vmem:[%s3255_s7 + $0x100] sm:$0xff]  ;;  %414 = vst [vmem:[%s3434_s29 + $0x60] sm:$0xff] %v413_v35  ;;  %430 = vst [vmem:[%s3434_s29 + $0x68] sm:$0xff] %v429_v43  ;;  %v431_v44 = vld [vmem:[%s3255_s7 + $0x108] sm:$0xff] }
  0x32   : >> { %v417_v37 = vld [vmem:[%s3255_s7 + $0x140] sm:$0xff]  ;;  %416 = vst [vmem:[%s3434_s29 + $0x80] sm:$0xff] %v415_v36  ;;  %v433_v45 = vld [vmem:[%s3255_s7 + $0x148] sm:$0xff]  ;;  %432 = vst [vmem:[%s3434_s29 + $0x88] sm:$0xff] %v431_v44 }
  0x33   : >> { %418 = vst [vmem:[%s3434_s29 + $0xa0] sm:$0xff] %v417_v37  ;;  %v419_v38 = vld [vmem:[%s3255_s7 + $0x180] sm:$0xff]  ;;  %v435_v46 = vld [vmem:[%s3255_s7 + $0x188] sm:$0xff]  ;;  %434 = vst [vmem:[%s3434_s29 + $0xa8] sm:$0xff] %v433_v45 }
  0x34   : >> { %v421_v39 = vld [vmem:[%s3255_s7 + $0x1c0] sm:$0xff]  ;;  %420 = vst [vmem:[%s3434_s29 + $0xc0] sm:$0xff] %v419_v38  ;;  %436 = vst [vmem:[%s3434_s29 + $0xc8] sm:$0xff] %v435_v46  ;;  %v437_v47 = vld [vmem:[%s3255_s7 + $0x1c8] sm:$0xff] }
  0x35   : >> { %422 = vst [vmem:[%s3434_s29 + $0xe0] sm:$0xff] %v421_v39  ;;  %v441_v49 = vld [vmem:[%s3255_s7 + $0x50] sm:$0xff]  ;;  %438 = vst [vmem:[%s3434_s29 + $0xe8] sm:$0xff] %v437_v47  ;;  %v455_v56 = vld [vmem:[%s3255_s7 + $0x18] sm:$0xff] }
  0x36   : >> { %440 = vst [vmem:[%s3434_s29 + $0x10] sm:$0xff] %v439_v48  ;;  %442 = vst [vmem:[%s3434_s29 + $0x30] sm:$0xff] %v441_v49  ;;  %v443_v50 = vld [vmem:[%s3255_s7 + $0x90] sm:$0xff]  ;;  %v457_v57 = vld [vmem:[%s3255_s7 + $0x58] sm:$0xff] }
  0x37   : >> { %v445_v51 = vld [vmem:[%s3255_s7 + $0xd0] sm:$0xff]  ;;  %444 = vst [vmem:[%s3434_s29 + $0x50] sm:$0xff] %v443_v50  ;;  %v459_v58 = vld [vmem:[%s3255_s7 + $0x98] sm:$0xff]  ;;  %456 = vst [vmem:[%s3434_s29 + $0x18] sm:$0xff] %v455_v56  ;;  %403 = sbr.rel (!%p400_p7) target bundleno = 45 (0x2d), region = 181 }
  0x38   : >> { %v447_v52 = vld [vmem:[%s3255_s7 + $0x110] sm:$0xff]  ;;  %446 = vst [vmem:[%s3434_s29 + $0x70] sm:$0xff] %v445_v51  ;;  %458 = vst [vmem:[%s3434_s29 + $0x38] sm:$0xff] %v457_v57  ;;  %v461_v59 = vld [vmem:[%s3255_s7 + $0xd8] sm:$0xff] }
  0x39   : >> { %448 = vst [vmem:[%s3434_s29 + $0x90] sm:$0xff] %v447_v52  ;;  %v449_v53 = vld [vmem:[%s3255_s7 + $0x150] sm:$0xff]  ;;  %460 = vst [vmem:[%s3434_s29 + $0x58] sm:$0xff] %v459_v58  ;;  %v463_v60 = vld [vmem:[%s3255_s7 + $0x118] sm:$0xff] }
  0x3a   : >> { %v451_v54 = vld [vmem:[%s3255_s7 + $0x190] sm:$0xff]  ;;  %450 = vst [vmem:[%s3434_s29 + $0xb0] sm:$0xff] %v449_v53  ;;  %v465_v61 = vld [vmem:[%s3255_s7 + $0x158] sm:$0xff]  ;;  %462 = vst [vmem:[%s3434_s29 + $0x78] sm:$0xff] %v461_v59 }
  0x3b   : >> { %v453_v55 = vld [vmem:[%s3255_s7 + $0x1d0] sm:$0xff]  ;;  %452 = vst [vmem:[%s3434_s29 + $0xd0] sm:$0xff] %v451_v54  ;;  %464 = vst [vmem:[%s3434_s29 + $0x98] sm:$0xff] %v463_v60  ;;  %v467_v62 = vld [vmem:[%s3255_s7 + $0x198] sm:$0xff] }
  0x3c   : >> { %454 = vst [vmem:[%s3434_s29 + $0xf0] sm:$0xff] %v453_v55  ;;  %466 = vst [vmem:[%s3434_s29 + $0xb8] sm:$0xff] %v465_v61  ;;  %v469_v63 = vld [vmem:[%s3255_s7 + $0x1d8] sm:$0xff]  ;;  %s4357_s7 = smov %s1969_s28 }
  0x3d   : >> { %468 = vst [vmem:[%s3434_s29 + $0xd8] sm:$0xff] %v467_v62  ;;  %470 = vst [vmem:[%s3434_s29 + $0xf8] sm:$0xff] %v469_v63 }
  0x3e PF: > { %p2147_p8 = scmp.ge.s32.totalorder %s3247_s25, 1  ;;  %p529_p9 = scmp.lt.s32.totalorder %s3247_s25, 3 }
  0x40   : > { %p530_p10 = pnand %p2147_p8, %p529_p9 }
  0x41   : > { %v741_v0 = vld [vmem:[%s4352_s4] sm:$0xff] (!%p530_p10)  ;;  %v742_v1 = vld [vmem:[%s4352_s4 + $0x8] sm:$0xff] (!%p530_p10)  ;;  %v743_v9 = vld [vmem:[%s4352_s4 + $0x10] sm:$0xff] (!%p530_p10)  ;;  %p607_p11 = scmp.lt.s32.totalorder (!%p530_p10), %s3239_s23, 1  ;;  %s536_s18 = sand.u32 (!%p530_p10), 1, %s3231_s21   ;;  %vm708_vm0 = vcmask (!%p530_p10), 1046528  }
  0x42   : > { %533 = sbr.rel (%p530_p10) target bundleno = 417 (0x1a1), region = 96  ;;  %v676_v2 = vld [vmem:[%s4351_s3 + $0x80] sm:$0xff] (!%p530_p10)  ;;  %v2795_v3 = vpack.c.bf16 (!%p530_p10), %v742_v1, %v741_v0  ;;  %v677_v4 = vld [vmem:[%s4351_s3 + $0x88] sm:$0xff] (!%p530_p10)  ;;  %v744_v10 = vld [vmem:[%s4352_s4 + $0x18] sm:$0xff] (!%p530_p10)  ;;  %s3604_s9 = sshll.u32 (!%p530_p10), %s536_s18, 8  ;;  %vm3262_vm1 = vmmov (!%p530_p10), 0  }
  0x43   : > { %v660_v5 = vld [vmem:[%s4351_s3] sm:$0xff] (!%p530_p10)  ;;  %v661_v6 = vld [vmem:[%s4351_s3 + $0x8] sm:$0xff] (!%p530_p10)  ;;  %v2827_v7 = vpack.c.bf16 (!%p530_p10), %v677_v4, %v676_v2  ;;  %v678_v11 = vld [vmem:[%s4351_s3 + $0x90] sm:$0xff] (!%p530_p10)  ;;  %v2799_v12 = vpack.c.bf16 (!%p530_p10), %v744_v10, %v743_v9  ;;  %s3631_s8 = scalar_lea.vmem (!%p530_p10), [#allocation3], %s3604_s9  ;;  %s3863_s29 = scalar_lea.vmem (!%p530_p10), [#allocation4], %s3604_s9 }
  0x44   : > { %v2829_v8 = vpack.c.bf16 (!%p530_p10), %v661_v6, %v660_v5  ;;  %2796 = vmatprep.subr.bf16.mxu0 (!%p530_p10), %v2795_v3  ;;  %v679_v13 = vld [vmem:[%s4351_s3 + $0x98] sm:$0xff] (!%p530_p10)  ;;  %v662_v14 = vld [vmem:[%s4351_s3 + $0x10] sm:$0xff] (!%p530_p10)  ;;  %v745_v17 = vld [vmem:[%s4352_s4 + $0x20] sm:$0xff] (!%p530_p10) }
  0x45   : > { %v663_v15 = vld [vmem:[%s4351_s3 + $0x18] sm:$0xff] (!%p530_p10)  ;;  %2828 = vmatprep.subr.bf16.mxu1 (!%p530_p10), %v2827_v7  ;;  %2798 = vmatpush3.bf16.msra.mxu0 (!%p530_p10), %v2795_v3  ;;  %v2831_v16 = vpack.c.bf16 (!%p530_p10), %v679_v13, %v678_v11  ;;  %v746_v18 = vld [vmem:[%s4352_s4 + $0x28] sm:$0xff] (!%p530_p10)  ;;  %v680_v19 = vld [vmem:[%s4351_s3 + $0xa0] sm:$0xff] (!%p530_p10) }
  0x46   : > { %2830 = vmatpush3.bf16.msra.mxu1 (!%p530_p10), %v2829_v8  ;;  %2800 = vmatprep.subr.bf16.mxu0 (!%p530_p10), %v2799_v12  ;;  %v2833_v20 = vpack.c.bf16 (!%p530_p10), %v663_v15, %v662_v14  ;;  %v2803_v21 = vpack.c.bf16 (!%p530_p10), %v746_v18, %v745_v17  ;;  %v681_v22 = vld [vmem:[%s4351_s3 + $0xa8] sm:$0xff] (!%p530_p10)  ;;  %v664_v23 = vld [vmem:[%s4351_s3 + $0x20] sm:$0xff] (!%p530_p10)  ;;  %v747_v26 = vld [vmem:[%s4352_s4 + $0x30] sm:$0xff] (!%p530_p10) }
  0x47   : > { %2832 = vmatprep.subr.bf16.mxu1 (!%p530_p10), %v2831_v16  ;;  %v2835_v24 = vpack.c.bf16 (!%p530_p10), %v681_v22, %v680_v19  ;;  %v665_v25 = vld [vmem:[%s4351_s3 + $0x28] sm:$0xff] (!%p530_p10)  ;;  %v748_v27 = vld [vmem:[%s4352_s4 + $0x38] sm:$0xff] (!%p530_p10)  ;;  %v682_v28 = vld [vmem:[%s4351_s3 + $0xb0] sm:$0xff] (!%p530_p10) }
  0x48   : > { %v683_v29 = vld [vmem:[%s4351_s3 + $0xb8] sm:$0xff] (!%p530_p10)  ;;  %v2837_v30 = vpack.c.bf16 (!%p530_p10), %v665_v25, %v664_v23  ;;  %v2807_v31 = vpack.c.bf16 (!%p530_p10), %v748_v27, %v747_v26  ;;  %v666_v32 = vld [vmem:[%s4351_s3 + $0x30] sm:$0xff] (!%p530_p10)  ;;  %v749_v35 = vld [vmem:[%s4352_s4 + $0x40] sm:$0xff] (!%p530_p10) }
  0x49   : > { %s4365_s23 = smov (!%p607_p11, %s3239_s23), 1  ;;  %2802 = vmatpush3.bf16.msra.mxu0 %v2799_v12  ;;  %v2839_v33 = vpack.c.bf16 %v683_v29, %v682_v28  ;;  %v667_v34 = vld [vmem:[%s4351_s3 + $0x38] sm:$0xff]  ;;  %v750_v36 = vld [vmem:[%s4352_s4 + $0x48] sm:$0xff]  ;;  %v684_v37 = vld [vmem:[%s4351_s3 + $0xc0] sm:$0xff] }
  0x4a   : > { %2834 = vmatpush3.bf16.msra.mxu1 %v2833_v20  ;;  %2804 = vmatprep.subr.bf16.mxu0 %v2803_v21  ;;  %v685_v38 = vld [vmem:[%s4351_s3 + $0xc8] sm:$0xff]  ;;  %v2841_v39 = vpack.c.bf16 %v667_v34, %v666_v32  ;;  %v2811_v40 = vpack.c.bf16 %v750_v36, %v749_v35  ;;  %v668_v41 = vld [vmem:[%s4351_s3 + $0x40] sm:$0xff]  ;;  %v751_v44 = vld [vmem:[%s4352_s4 + $0x50] sm:$0xff]  ;;  %s3069_s7 = smul.u32 576, %s4365_s23  ;;  %s2330_s11 = sshll.u32 %s4365_s23, 6 }
  0x4b   : > { %2836 = vmatprep.subr.bf16.mxu1 %v2835_v24  ;;  %v2843_v42 = vpack.c.bf16 %v685_v38, %v684_v37  ;;  %v669_v43 = vld [vmem:[%s4351_s3 + $0x48] sm:$0xff]  ;;  %v752_v45 = vld [vmem:[%s4352_s4 + $0x58] sm:$0xff]  ;;  %v686_v46 = vld [vmem:[%s4351_s3 + $0xd0] sm:$0xff]  ;;  %s4322_s14 = scalar_lea.vmem %s4354_s6, %s2330_s11 }
  0x4c   : > { %v687_v47 = vld [vmem:[%s4351_s3 + $0xd8] sm:$0xff]  ;;  %v629_v48 = vld [vmem:[%s3631_s8 + $0x8] sm:$0xff]  ;;  %v644_v49 = vld [vmem:[%s3631_s8] sm:$0xfe]  ;;  %v2845_v51 = vpack.c.bf16 %v669_v43, %v668_v41  ;;  %v2815_v52 = vpack.c.bf16 %v752_v45, %v751_v44  ;;  %s3999_s28 = sadd.s32 512, %s3069_s7 }
  0x4d   : > { %2806 = vmatpush3.bf16.msra.mxu0 %v2803_v21  ;;  %v645_v50 = vld [vmem:[%s3631_s8 + $0x10] sm:$0x1]  ;;  %v709_v54 = vrot.slane %v644_v49, 1  ;;  %v2847_v56 = vpack.c.bf16 %v687_v47, %v686_v46  ;;  %v671_v57 = vld [vmem:[%s4351_s3 + $0x58] sm:$0xff]  ;;  %v753_v58 = vld [vmem:[%s4352_s4 + $0x60] sm:$0xff]  ;;  %926 = vmatprep.mubr.f32.mxu1 %v629_v48  ;;  %s4080_s15 = scalar_lea.vmem %s4350_s2, %s3999_s28 }
  0x4e   : > { %2838 = vmatpush3.bf16.msra.mxu1 %v2837_v30  ;;  %2808 = vmatprep.subr.bf16.mxu0 %v2807_v31  ;;  %v670_v53 = vld [vmem:[%s4351_s3 + $0x50] sm:$0xff]  ;;  %v710_v55 = vrot.slane %v645_v50, 1  ;;  %v754_v59 = vld [vmem:[%s4352_s4 + $0x68] sm:$0xff]  ;;  %v688_v60 = vld [vmem:[%s4351_s3 + $0xe0] sm:$0xff] }
  0x4f   : > { %2840 = vmatprep.subr.bf16.mxu1 %v2839_v33  ;;  %v689_v61 = vld [vmem:[%s4351_s3 + $0xe8] sm:$0xff]  ;;  %v2849_v63 = vpack.c.bf16 %v671_v57, %v670_v53  ;;  %v2819_v0 = vpack.c.bf16 %v754_v59, %v753_v58  ;;  %v672_v1 = vld [vmem:[%s4351_s3 + $0x60] sm:$0xff]  ;;  %v755_v4 = vld [vmem:[%s4352_s4 + $0x70] sm:$0xff] }
  0x50   : > { %v711_v62 = vsel %vm708_vm0, %v709_v54, %v710_v55  ;;  %v2851_v2 = vpack.c.bf16 %v689_v61, %v688_v60  ;;  %v673_v3 = vld [vmem:[%s4351_s3 + $0x68] sm:$0xff]  ;;  %v756_v5 = vld [vmem:[%s4352_s4 + $0x78] sm:$0xff]  ;;  %v690_v6 = vld [vmem:[%s4351_s3 + $0xf0] sm:$0xff] }
  0x51   : > { %2810 = vmatpush3.bf16.msra.mxu0 %v2807_v31  ;;  %2651 = vmatprep.mubr.f32.mxu0 %v711_v62  ;;  %v691_v7 = vld [vmem:[%s4351_s3 + $0xf8] sm:$0xff]  ;;  %v2853_v8 = vpack.c.bf16 %v673_v3, %v672_v1  ;;  %v2823_v9 = vpack.c.bf16 %v756_v5, %v755_v4  ;;  %v674_v10 = vld [vmem:[%s4351_s3 + $0x70] sm:$0xff]  ;;  %v646_v11 = vld [vmem:[%s3631_s8 + $0x20] sm:$0xfe] }
  0x52   : > { %2842 = vmatpush3.bf16.msra.mxu1 %v2841_v39  ;;  %2812 = vmatprep.subr.bf16.mxu0 %v2811_v40  ;;  %v647_v12 = vld [vmem:[%s3631_s8 + $0x30] sm:$0x1]  ;;  %v2855_v13 = vpack.c.bf16 %v691_v7, %v690_v6  ;;  %v675_v14 = vld [vmem:[%s4351_s3 + $0x78] sm:$0xff]  ;;  %v2186_v15 = vld [vmem:[%s4352_s4 + $0x80] sm:$0xff]  ;;  %v712_v19 = vrot.slane %v646_v11, 1 }
  0x53   : > { %2844 = vmatprep.subr.bf16.mxu1 %v2843_v42  ;;  %v2187_v16 = vld [vmem:[%s4352_s4 + $0x88] sm:$0xff]  ;;  %v2170_v17 = vld [vmem:[%s4351_s3 + $0x180] sm:$0xff]  ;;  %v713_v20 = vrot.slane %v647_v12, 1  ;;  %v2857_v21 = vpack.c.bf16 %v675_v14, %v674_v10  ;;  %v2188_v26 = vld [vmem:[%s4352_s4 + $0x90] sm:$0xff] }
  0x54   : > { %v2171_v18 = vld [vmem:[%s4351_s3 + $0x188] sm:$0xff]  ;;  %v2859_v22 = vpack.c.bf16 %v2187_v16, %v2186_v15  ;;  %v2154_v23 = vld [vmem:[%s4351_s3 + $0x100] sm:$0xff]  ;;  %v2189_v27 = vld [vmem:[%s4352_s4 + $0x98] sm:$0xff] }
  0x55   : > { %2814 = vmatpush3.bf16.msra.mxu0 %v2811_v40  ;;  %v2155_v24 = vld [vmem:[%s4351_s3 + $0x108] sm:$0xff]  ;;  %v2891_v25 = vpack.c.bf16 %v2171_v18, %v2170_v17  ;;  %v648_v28 = vld [vmem:[%s3631_s8 + $0x40] sm:$0xfe]  ;;  %v2172_v29 = vld [vmem:[%s4351_s3 + $0x190] sm:$0xff]  ;;  %v714_v33 = vsel %vm708_vm0, %v712_v19, %v713_v20  ;;  %v2863_v40 = vpack.c.bf16 %v2189_v27, %v2188_v26 }
  0x56   : > { %2846 = vmatpush3.bf16.msra.mxu1 %v2845_v51  ;;  %2816 = vmatprep.subr.bf16.mxu0 %v2815_v52  ;;  %v2173_v30 = vld [vmem:[%s4351_s3 + $0x198] sm:$0xff]  ;;  %v649_v31 = vld [vmem:[%s3631_s8 + $0x50] sm:$0x1]  ;;  %v628_v32 = vld [vmem:[%s3631_s8] sm:$0xff]  ;;  %v715_v34 = vrot.slane %v648_v28, 1  ;;  %v2893_v36 = vpack.c.bf16 %v2155_v24, %v2154_v23 }
  0x57   : > { %2848 = vmatprep.subr.bf16.mxu1 %v2847_v56  ;;  %v716_v35 = vrot.slane %v649_v31, 1  ;;  %v3716_v37 = vld [vmem:[%s3631_s8 + $0x28] sm:$0xff]  ;;  %v650_v38 = vld [vmem:[%s3631_s8 + $0x60] sm:$0xfe]  ;;  %v651_v39 = vld [vmem:[%s3631_s8 + $0x70] sm:$0x1]  ;;  %v2895_v41 = vpack.c.bf16 %v2173_v30, %v2172_v29 }
  0x58   : > { %v2156_v42 = vld [vmem:[%s4351_s3 + $0x110] sm:$0xff]  ;;  %v2157_v43 = vld [vmem:[%s4351_s3 + $0x118] sm:$0xff]  ;;  %v2190_v44 = vld [vmem:[%s4352_s4 + $0xa0] sm:$0xff]  ;;  %v718_v50 = vrot.slane %v650_v38, 1  ;;  %v719_v51 = vrot.slane %v651_v39, 1 }
  0x59   : > { %2818 = vmatpush3.bf16.msra.mxu0 %v2815_v52  ;;  %v2191_v45 = vld [vmem:[%s4352_s4 + $0xa8] sm:$0xff]  ;;  %v2174_v46 = vld [vmem:[%s4351_s3 + $0x1a0] sm:$0xff]  ;;  %v717_v49 = vsel %vm708_vm0, %v715_v34, %v716_v35  ;;  %v2897_v52 = vpack.c.bf16 %v2157_v43, %v2156_v42  ;;  %v653_v55 = vld [vmem:[%s3631_s8 + $0x90] sm:$0x1] }
  0x5a   : > { %2850 = vmatpush3.bf16.msra.mxu1 %v2849_v63  ;;  %2820 = vmatprep.subr.bf16.mxu0 %v2819_v0  ;;  %v2175_v47 = vld [vmem:[%s4351_s3 + $0x1a8] sm:$0xff]  ;;  %v3739_v48 = vld [vmem:[%s3631_s8 + $0x20] sm:$0xff]  ;;  %v2867_v56 = vpack.c.bf16 %v2191_v45, %v2190_v44  ;;  %v2192_v60 = vld [vmem:[%s4352_s4 + $0xb0] sm:$0xff]  ;;  %v720_v1 = vsel %vm708_vm0, %v718_v50, %v719_v51  ;;  %v722_v3 = vrot.slane %v653_v55, 1 }
  0x5b   : > { %2852 = vmatprep.subr.bf16.mxu1 %v2851_v2  ;;  %v3744_v53 = vld [vmem:[%s3631_s8 + $0x48] sm:$0xff]  ;;  %v652_v54 = vld [vmem:[%s3631_s8 + $0x80] sm:$0xfe]  ;;  %v2899_v57 = vpack.c.bf16 %v2175_v47, %v2174_v46  ;;  %v2193_v61 = vld [vmem:[%s4352_s4 + $0xb8] sm:$0xff] }
  0x5c   : > { %v2158_v58 = vld [vmem:[%s4351_s3 + $0x120] sm:$0xff]  ;;  %v2159_v59 = vld [vmem:[%s4351_s3 + $0x128] sm:$0xff]  ;;  %v2176_v62 = vld [vmem:[%s4351_s3 + $0x1b0] sm:$0xff]  ;;  %v721_v2 = vrot.slane %v652_v54, 1 }
  0x5d   : > { %2822 = vmatpush3.bf16.msra.mxu0 %v2819_v0  ;;  %v2177_v63 = vld [vmem:[%s4351_s3 + $0x1b8] sm:$0xff]  ;;  %v3768_v0 = vld [vmem:[%s3631_s8 + $0x40] sm:$0xff]  ;;  %v2901_v4 = vpack.c.bf16 %v2159_v59, %v2158_v58  ;;  %v3773_v5 = vld [vmem:[%s3631_s8 + $0x68] sm:$0xff] }
  0x5e   : > { %2854 = vmatpush3.bf16.msra.mxu1 %v2853_v8  ;;  %2824 = vmatprep.subr.bf16.mxu0 %v2823_v9  ;;  %v654_v6 = vld [vmem:[%s3631_s8 + $0xa0] sm:$0xfe]  ;;  %v655_v7 = vld [vmem:[%s3631_s8 + $0xb0] sm:$0x1]  ;;  %v2871_v8 = vpack.c.bf16 %v2193_v61, %v2192_v60  ;;  %v2161_v11 = vld [vmem:[%s4351_s3 + $0x138] sm:$0xff]  ;;  %v723_v17 = vsel %vm708_vm0, %v721_v2, %v722_v3 }
  0x5f   : > { %2856 = vmatprep.subr.bf16.mxu1 %v2855_v13  ;;  %v2160_v10 = vld [vmem:[%s4351_s3 + $0x130] sm:$0xff]  ;;  %v2194_v12 = vld [vmem:[%s4352_s4 + $0xc0] sm:$0xff]  ;;  %v2195_v13 = vld [vmem:[%s4352_s4 + $0xc8] sm:$0xff]  ;;  %v724_v18 = vrot.slane %v654_v6, 1  ;;  %v725_v19 = vrot.slane %v655_v7, 1 }
  0x60   : > { %v2178_v14 = vld [vmem:[%s4351_s3 + $0x1c0] sm:$0xff]  ;;  %v2179_v15 = vld [vmem:[%s4351_s3 + $0x1c8] sm:$0xff]  ;;  %v2905_v20 = vpack.c.bf16 %v2161_v11, %v2160_v10  ;;  %v657_v23 = vld [vmem:[%s3631_s8 + $0xd0] sm:$0x1]  ;;  %v2875_v24 = vpack.c.bf16 %v2195_v13, %v2194_v12 }
  0x61   : > { %2826 = vmatpush3.bf16.msra.mxu0 %v2823_v9  ;;  %v2903_v9 = vpack.c.bf16 %v2177_v63, %v2176_v62  ;;  %v3797_v16 = vld [vmem:[%s3631_s8 + $0x60] sm:$0xff]  ;;  %v2163_v27 = vld [vmem:[%s4351_s3 + $0x148] sm:$0xff]  ;;  %v2196_v28 = vld [vmem:[%s4352_s4 + $0xd0] sm:$0xff]  ;;  %v728_v35 = vrot.slane %v657_v23, 1 }
  0x62   : > { %2858 = vmatpush3.bf16.msra.mxu1 %v2857_v21  ;;  %2860 = vmatprep.subr.bf16.mxu0 %v2859_v22  ;;  %v3802_v21 = vld [vmem:[%s3631_s8 + $0x88] sm:$0xff]  ;;  %v2162_v26 = vld [vmem:[%s4351_s3 + $0x140] sm:$0xff]  ;;  %v2197_v29 = vld [vmem:[%s4352_s4 + $0xd8] sm:$0xff] }
  0x63   : > { %2892 = vmatprep.subr.bf16.mxu1 %v2891_v25  ;;  %v2907_v25 = vpack.c.bf16 %v2179_v15, %v2178_v14  ;;  %v2180_v30 = vld [vmem:[%s4351_s3 + $0x1d0] sm:$0xff]  ;;  %v2181_v31 = vld [vmem:[%s4351_s3 + $0x1d8] sm:$0xff]  ;;  %v3831_v38 = vld [vmem:[%s3631_s8 + $0xa8] sm:$0xff] }
  0x64   : > { %2652 = vmatmul.mubr.f32.vlgmr.msra.gmra.mrb[0].mxu0 %v714_v33  ;;  %v726_v33 = vsel %vm708_vm0, %v724_v18, %v725_v19  ;;  %v658_v39 = vld [vmem:[%s3631_s8 + $0xe0] sm:$0xfe]  ;;  %v2911_v42 = vpack.c.bf16 %v2181_v31, %v2180_v30  ;;  %v2164_v43 = vld [vmem:[%s4351_s3 + $0x150] sm:$0xff]  ;;  %v2165_v44 = vld [vmem:[%s4351_s3 + $0x158] sm:$0xff] }
  0x65   : > { %927 = vmatmul.mubr.f32.vlgmr.msra.gmra.mrb[0].mxu1 %v628_v32  ;;  %2862 = vmatpush3.bf16.msra.mxu0 %v2859_v22  ;;  %v656_v22 = vld [vmem:[%s3631_s8 + $0xc0] sm:$0xfe]  ;;  %v2199_v46 = vld [vmem:[%s4352_s4 + $0xe8] sm:$0xff]  ;;  %v2913_v55 = vpack.c.bf16 %v2165_v44, %v2164_v43  ;;  %v1015_v58 = vld [vmem:[%s3863_s29 + $0x10] sm:$0x1] }
  0x66   : > { %2894 = vmatpush3.bf16.msra.mxu1 %v2893_v36  ;;  %931 = vmatprep.mubr.f32.mxu1 %v3716_v37  ;;  %v3826_v32 = vld [vmem:[%s3631_s8 + $0x80] sm:$0xff]  ;;  %v727_v34 = vrot.slane %v656_v22, 1  ;;  %v2909_v36 = vpack.c.bf16 %v2163_v27, %v2162_v26  ;;  %v2167_v62 = vld [vmem:[%s4351_s3 + $0x168] sm:$0xff]  ;;  %v2200_v63 = vld [vmem:[%s4352_s4 + $0xf0] sm:$0xff] }
  0x67   : > { %2864 = vmatprep.subr.bf16.mxu0 %v2863_v40  ;;  %2896 = vmatprep.subr.bf16.mxu1 %v2895_v41  ;;  %v2879_v41 = vpack.c.bf16 %v2197_v29, %v2196_v28  ;;  %v2198_v45 = vld [vmem:[%s4352_s4 + $0xe0] sm:$0xff]  ;;  %v2184_v2 = vld [vmem:[%s4351_s3 + $0x1f0] sm:$0xff]  ;;  %v2185_v3 = vld [vmem:[%s4351_s3 + $0x1f8] sm:$0xff] }
  0x68   : > { %2654 = vmatprep.mubr.f32.mxu0 %v717_v49  ;;  %v2182_v47 = vld [vmem:[%s4351_s3 + $0x1e0] sm:$0xff]  ;;  %v2183_v49 = vld [vmem:[%s4351_s3 + $0x1e8] sm:$0xff]  ;;  %v729_v51 = vsel %vm708_vm0, %v727_v34, %v728_v35  ;;  %v2883_v59 = vpack.c.bf16 %v2199_v46, %v2198_v45  ;;  %v2168_v11 = vld [vmem:[%s4351_s3 + $0x170] sm:$0xff]  ;;  %v2919_v15 = vpack.c.bf16 %v2185_v3, %v2184_v2  ;;  %v3261_v2 = vmov 0.0|0.0  }
  0x69   : > { %932 = vmatmul.mubr.f32.gmra.mrb[2].mxu1 %v3739_v48  ;;  %2866 = vmatpush3.bf16.msra.mxu0 %v2863_v40  ;;  %v659_v40 = vld [vmem:[%s3631_s8 + $0xf0] sm:$0x1]  ;;  %v3855_v50 = vld [vmem:[%s3631_s8 + $0xa0] sm:$0xff]  ;;  %v2915_v60 = vpack.c.bf16 %v2183_v49, %v2182_v47  ;;  %v3890_v6 = vld [vmem:[%s3631_s8 + $0xe8] sm:$0xff] }
  0x6a   : > { %2898 = vmatpush3.bf16.msra.mxu1 %v2897_v52  ;;  %936 = vmatprep.mubr.f32.mxu1 %v3744_v53  ;;  %v730_v52 = vrot.slane %v658_v39, 1  ;;  %v731_v54 = vrot.slane %v659_v40, 1  ;;  %v2166_v61 = vld [vmem:[%s4351_s3 + $0x160] sm:$0xff]  ;;  %v1017_v13 = vld [vmem:[%s3863_s29 + $0x30] sm:$0x1]  ;;  %v2247_v23 = vld [vmem:[%s4351_s3 + $0x288] sm:$0xff] }
  0x6b   : > { %2868 = vmatprep.subr.bf16.mxu0 %v2867_v56  ;;  %2900 = vmatprep.subr.bf16.mxu1 %v2899_v57  ;;  %v1014_v57 = vld [vmem:[%s3863_s29] sm:$0xfe]  ;;  %v2917_v10 = vpack.c.bf16 %v2167_v62, %v2166_v61  ;;  %v1019_v19 = vld [vmem:[%s3863_s29 + $0x50] sm:$0x1]  ;;  %v1083_v27 = vrot.slane %v1017_v13, 1  ;;  %v2231_v40 = vld [vmem:[%s4351_s3 + $0x208] sm:$0xff] }
  0x6c   : > { %2655 = vmatmul.mubr.f32.gmra.mrb[2].mxu0 %v720_v1  ;;  %v2201_v1 = vld [vmem:[%s4352_s4 + $0xf8] sm:$0xff]  ;;  %v732_v7 = vsel %vm708_vm0, %v730_v52, %v731_v54  ;;  %v1016_v12 = vld [vmem:[%s3863_s29 + $0x20] sm:$0xfe]  ;;  %v1021_v29 = vld [vmem:[%s3863_s29 + $0x70] sm:$0x1] }
  0x6d   : > { %937 = vmatmul.mubr.f32.gmra.mrb[4].mxu1 %v3768_v0  ;;  %2870 = vmatpush3.bf16.msra.mxu0 %v2867_v56  ;;  %v3860_v56 = vld [vmem:[%s3631_s8 + $0xc8] sm:$0xff]  ;;  %v2887_v14 = vpack.c.bf16 %v2201_v1, %v2200_v63  ;;  %v1018_v18 = vld [vmem:[%s3863_s29 + $0x40] sm:$0xfe]  ;;  %v1082_v26 = vrot.slane %v1016_v12, 1  ;;  %v3923_v35 = vld [vmem:[%s3863_s29 + $0x90] sm:$0x1] }
  0x6e   : > { %2902 = vmatpush3.bf16.msra.mxu1 %v2901_v4  ;;  %941 = vmatprep.mubr.f32.mxu1 %v3773_v5  ;;  %v3887_v4 = vld [vmem:[%s3631_s8 + $0xc0] sm:$0xff]  ;;  %v1085_v31 = vrot.slane %v1018_v18, 1  ;;  %v2263_v43 = vld [vmem:[%s4352_s4 + $0x108] sm:$0xff]  ;;  %v1089_v45 = vrot.slane %v1021_v29, 1  ;;  %v2248_v46 = vld [vmem:[%s4351_s3 + $0x290] sm:$0xff] }
  0x6f   : > { %2872 = vmatprep.subr.bf16.mxu0 %v2871_v8  ;;  %2904 = vmatprep.subr.bf16.mxu1 %v2903_v9  ;;  %v1080_v9 = vrot.slane %v1015_v58, 1  ;;  %v2246_v22 = vld [vmem:[%s4351_s3 + $0x280] sm:$0xff]  ;;  %v2249_v47 = vld [vmem:[%s4351_s3 + $0x298] sm:$0xff]  ;;  %v1084_v49 = vsel %vm708_vm0, %v1082_v26, %v1083_v27  ;;  %v2232_v52 = vld [vmem:[%s4351_s3 + $0x210] sm:$0xff] }
  0x70   : > { %2657 = vmatprep.mubr.f32.mxu0 %v723_v17  ;;  %v2169_v17 = vld [vmem:[%s4351_s3 + $0x178] sm:$0xff]  ;;  %v1020_v28 = vld [vmem:[%s3863_s29 + $0x60] sm:$0xfe]  ;;  %v3967_v63 = vld [vmem:[%s3863_s29 + $0xd0] sm:$0x1] }
  0x71   : > { %942 = vmatmul.mubr.f32.gmra.mrb[6].mxu1 %v3797_v16  ;;  %2874 = vmatpush3.bf16.msra.mxu0 %v2871_v8  ;;  %v1079_v8 = vrot.slane %v1014_v57, 1  ;;  %v2921_v30 = vpack.c.bf16 %v2169_v17, %v2168_v11  ;;  %v3920_v34 = vld [vmem:[%s3863_s29 + $0x80] sm:$0xfe]  ;;  %v1088_v44 = vrot.slane %v1020_v28, 1  ;;  %v2233_v54 = vld [vmem:[%s4351_s3 + $0x218] sm:$0xff]  ;;  %v1092_v57 = vrot.slane %v3923_v35, 1 }
  0x72   : > { %2906 = vmatpush3.bf16.msra.mxu1 %v2905_v20  ;;  %946 = vmatprep.mubr.f32.mxu1 %v3802_v21  ;;  %v3905_v20 = vld [vmem:[%s3631_s8 + $0xe0] sm:$0xff]  ;;  %v2267_v26 = vld [vmem:[%s4352_s4 + $0x128] sm:$0xff]  ;;  %v4016_v28 = vpack.c.bf16 %v2233_v54, %v2232_v52  ;;  %v2217_v35 = vld [vmem:[%s3631_s8 + $0x30] sm:$0x1] }
  0x73   : > { %2876 = vmatprep.subr.bf16.mxu0 %v2875_v24  ;;  %2908 = vmatprep.subr.bf16.mxu1 %v2907_v25  ;;  %v999_v25 = vld [vmem:[%s3863_s29 + $0x8] sm:$0xff]  ;;  %v2230_v39 = vld [vmem:[%s4351_s3 + $0x200] sm:$0xff]  ;;  %v1090_v18 = vsel %vm708_vm0, %v1088_v44, %v1089_v45  ;;  %v2219_v44 = vld [vmem:[%s3631_s8 + $0x50] sm:$0x1] }
  0x74   : > { %2658 = vmatmul.mubr.f32.gmra.mrb[4].mxu0 %v726_v33  ;;  %v1086_v33 = vrot.slane %v1019_v19, 1  ;;  %v1024_v58 = vld [vmem:[%s3863_s29 + $0xa0] sm:$0xfe]  ;;  %v1003_v19 = vld [vmem:[%s3863_s29 + $0x48] sm:$0xff]  ;;  %v2221_v54 = vld [vmem:[%s3631_s8 + $0x70] sm:$0x1] }
  0x75   : > { %947 = vmatmul.mubr.f32.gmra.mrb[8].mxu1 %v3826_v32  ;;  %2878 = vmatpush3.bf16.msra.mxu0 %v2875_v24  ;;  %v1081_v24 = vsel %vm708_vm0, %v1079_v8, %v1080_v9  ;;  %v3964_v62 = vld [vmem:[%s3863_s29 + $0xc0] sm:$0xfe]  ;;  %v2264_v8 = vld [vmem:[%s4352_s4 + $0x110] sm:$0xff]  ;;  %v2265_v9 = vld [vmem:[%s4352_s4 + $0x118] sm:$0xff]  ;;  %v1094_v12 = vrot.slane %v1024_v58, 1 }
  0x76   : > { %2910 = vmatpush3.bf16.msra.mxu1 %v2909_v36  ;;  %951 = vmatprep.mubr.f32.mxu1 %v3831_v38  ;;  %v3925_v36 = vpack.c.bf16 %v2247_v23, %v2246_v22  ;;  %v1087_v61 = vsel %vm708_vm0, %v1085_v31, %v1086_v33  ;;  %v3970_v1 = vld [vmem:[%s3863_s29 + $0xe0] sm:$0xfe]  ;;  %v2235_v22 = vld [vmem:[%s4351_s3 + $0x228] sm:$0xff]  ;;  %v1097_v23 = vrot.slane %v3964_v62, 1  ;;  %v2252_v31 = vld [vmem:[%s4351_s3 + $0x2b0] sm:$0xff] }
  0x77   : > { %2880 = vmatprep.subr.bf16.mxu0 %v2879_v41  ;;  %2912 = vmatprep.subr.bf16.mxu1 %v2911_v42  ;;  %v998_v42 = vld [vmem:[%s3863_s29] sm:$0xff]  ;;  %v1100_v27 = vrot.slane %v3970_v1, 1  ;;  %v2253_v33 = vld [vmem:[%s4351_s3 + $0x2b8] sm:$0xff]  ;;  %v2236_v58 = vld [vmem:[%s4351_s3 + $0x230] sm:$0xff] }
  0x78   : > { %2660 = vmatprep.mubr.f32.mxu0 %v729_v51  ;;  %v1001_v51 = vld [vmem:[%s3863_s29 + $0x28] sm:$0xff]  ;;  %v1000_v11 = vld [vmem:[%s3863_s29 + $0x20] sm:$0xff] }
  0x79   : > { %952 = vmatmul.mubr.f32.gmra.mrb[10].mxu1 %v3855_v50  ;;  %2882 = vmatpush3.bf16.msra.mxu0 %v2879_v41  ;;  %v2262_v41 = vld [vmem:[%s4352_s4 + $0x100] sm:$0xff] }
  0x7a   : > { %2914 = vmatpush3.bf16.msra.mxu1 %v2913_v55  ;;  %956 = vmatprep.mubr.f32.mxu1 %v3860_v56  ;;  %v1091_v55 = vrot.slane %v3920_v34, 1  ;;  %v3974_v3 = vpack.c.bf16 %v2263_v43, %v2262_v41  ;;  %v2234_v17 = vld [vmem:[%s4351_s3 + $0x220] sm:$0xff] }
  0x7b   : > { %2884 = vmatprep.subr.bf16.mxu0 %v2883_v59  ;;  %2916 = vmatprep.subr.bf16.mxu1 %v2915_v60  ;;  %v3960_v60 = vpack.c.bf16 %v2231_v40, %v2230_v39  ;;  %v2216_v34 = vld [vmem:[%s3631_s8 + $0x20] sm:$0xfe]  ;;  %v4030_v39 = vpack.c.bf16 %v2265_v9, %v2264_v8  ;;  %v2223_v9 = vld [vmem:[%s3631_s8 + $0x90] sm:$0x1] }
  0x7c   : > { %2661 = vmatmul.mubr.f32.gmra.mrb[6].mxu0 %v732_v7  ;;  %v3976_v7 = vpack.c.bf16 %v2249_v47, %v2248_v46  ;;  %v1093_v29 = vsel %vm708_vm0, %v1091_v55, %v1092_v57  ;;  %v1437_v41 = vrot.slane %v2216_v34, 1  ;;  %v2218_v43 = vld [vmem:[%s3631_s8 + $0x40] sm:$0xfe]  ;;  %v4039_v47 = vpack.c.bf16 %v2235_v22, %v2234_v17  ;;  %v1005_v55 = vld [vmem:[%s3863_s29 + $0x68] sm:$0xff] }
  0x7d   : > { %957 = vmatmul.mubr.f32.gmra.mrb[12].mxu1 %v3887_v4  ;;  %2886 = vmatpush3.bf16.msra.mxu0 %v2883_v59  ;;  %v1025_v59 = vld [vmem:[%s3863_s29 + $0xb0] sm:$0x1]  ;;  %v1002_v46 = vld [vmem:[%s3863_s29 + $0x40] sm:$0xff] }
  0x7e   : > { %2918 = vmatpush3.bf16.msra.mxu1 %v2917_v10  ;;  %961 = vmatprep.mubr.f32.mxu1 %v3890_v6  ;;  %v3985_v10 = vld [vmem:[%s3863_s29 + $0xf0] sm:$0x1]  ;;  %v1095_v13 = vrot.slane %v1025_v59, 1  ;;  %v2220_v52 = vld [vmem:[%s3631_s8 + $0x60] sm:$0xfe]  ;;  %v2237_v59 = vld [vmem:[%s4351_s3 + $0x238] sm:$0xff] }
  0x7f   : > { %2888 = vmatprep.subr.bf16.mxu0 %v2887_v14  ;;  %2920 = vmatprep.subr.bf16.mxu1 %v2919_v15  ;;  %v2251_v15 = vld [vmem:[%s4351_s3 + $0x2a8] sm:$0xff]  ;;  %v1443_v62 = vrot.slane %v2220_v52, 1  ;;  %v2222_v8 = vld [vmem:[%s3631_s8 + $0x80] sm:$0xfe] }
  0x80   : > { %2695 = vmatprep.mubr.f32.mxu0 %v1081_v24  ;;  %v1098_v24 = vrot.slane %v3967_v63, 1  ;;  %v1096_v45 = vsel %vm708_vm0, %v1094_v12, %v1095_v13  ;;  %v1444_v63 = vrot.slane %v2221_v54, 1  ;;  %v2268_v12 = vld [vmem:[%s4352_s4 + $0x130] sm:$0xff]  ;;  %v2269_v13 = vld [vmem:[%s4352_s4 + $0x138] sm:$0xff]  ;;  %v2224_v22 = vld [vmem:[%s3631_s8 + $0xa0] sm:$0xfe] }
  0x81   : > { %962 = vmatmul.mubr.f32.gmra.mrb[14].mxu1 %v3905_v20  ;;  %2890 = vmatpush3.bf16.msra.mxu0 %v2887_v14  ;;  %v2250_v14 = vld [vmem:[%s4351_s3 + $0x2a0] sm:$0xff] }
  0x82   : > { %2922 = vmatpush3.bf16.msra.mxu1 %v2921_v30  ;;  %1297 = vmatprep.mubr.f32.mxu1 %v999_v25  ;;  %v2266_v25 = vld [vmem:[%s4352_s4 + $0x120] sm:$0xff]  ;;  %v1101_v30 = vrot.slane %v3985_v10, 1  ;;  %v4032_v40 = vpack.c.bf16 %v2251_v15, %v2250_v14  ;;  %v2255_v15 = vld [vmem:[%s4351_s3 + $0x2c8] sm:$0xff]  ;;  %v1700_v10 = vld [vmem:[%s4080_s15 + $0x10] sm:$0x1] }
  0x83   : > { %2948 = vmatprep.subr.bf16.mxu1 %v3925_v36  ;;  %2923 = vmatprep.subr.bf16.mxu0 %v3261_v2  ;;  %v4044_v57 = vpack.c.bf16 %v2267_v26, %v2266_v25  ;;  %v2254_v14 = vld [vmem:[%s4351_s3 + $0x2c0] sm:$0xff]  ;;  %v4087_v25 = vsel %vm708_vm0, %v1443_v62, %v1444_v63  ;;  %v1449_v26 = vrot.slane %v2224_v22, 1  ;;  %v4108_v62 = vpack.c.bf16 %v2237_v59, %v2236_v58  ;;  %v2239_v58 = vld [vmem:[%s4351_s3 + $0x248] sm:$0xff] }
  0x84   : > { %2696 = vmatmul.mubr.f32.vlgmr.msra.gmra.mrb[0].mxu0 %v1084_v49  ;;  %v1440_v49 = vrot.slane %v2218_v43, 1  ;;  %v2226_v34 = vld [vmem:[%s3631_s8 + $0xc0] sm:$0xfe]  ;;  %v1009_v22 = vld [vmem:[%s3863_s29 + $0xa8] sm:$0xff] }
  0x85   : > { %1298 = vmatmul.mubr.f32.vlgmr.msra.gmra.mrb[16].mxu1 %v998_v42  ;;  %2698 = vmatprep.mubr.f32.mxu0 %v1087_v61  ;;  %v1438_v42 = vrot.slane %v2217_v35, 1  ;;  %v2227_v35 = vld [vmem:[%s3631_s8 + $0xd0] sm:$0x1]  ;;  %v1699_v52 = vld [vmem:[%s4080_s15] sm:$0xfe] }
  0x86   : > { %2950 = vmatpush3.bf16.msra.mxu1 %v3960_v60  ;;  %1302 = vmatprep.mubr.f32.mxu1 %v1001_v51  ;;  %v1441_v51 = vrot.slane %v2219_v44, 1  ;;  %v1453_v43 = vrot.slane %v2227_v35, 1  ;;  %v1102_v44 = vsel %vm708_vm0, %v1100_v27, %v1101_v30  ;;  %v1004_v54 = vld [vmem:[%s3863_s29 + $0x60] sm:$0xff]  ;;  %v1751_v1 = vrot.slane %v1699_v52, 1  ;;  %v2272_v35 = vld [vmem:[%s4352_s4 + $0x150] sm:$0xff] }
  0x87   : > { %2925 = vmatpush3.bf16.msra.mxu0 %v3974_v3  ;;  %2952 = vmatprep.subr.bf16.mxu1 %v3976_v7  ;;  %v4053_v61 = vsel %vm708_vm0, %v1437_v41, %v1438_v42  ;;  %v1452_v42 = vrot.slane %v2226_v34, 1  ;;  %v4117_v27 = vpack.c.bf16 %v2269_v13, %v2268_v12  ;;  %v4119_v30 = vpack.c.bf16 %v2255_v15, %v2254_v14  ;;  %v2270_v59 = vld [vmem:[%s4352_s4 + $0x140] sm:$0xff]  ;;  %v2256_v12 = vld [vmem:[%s4351_s3 + $0x2d0] sm:$0xff]  ;;  %v2257_v13 = vld [vmem:[%s4351_s3 + $0x2d8] sm:$0xff] }
  0x88   : > { %2699 = vmatmul.mubr.f32.gmra.mrb[2].mxu0 %v1090_v18  ;;  %2926 = vmatprep.subr.bf16.mxu0 %v3261_v2  ;;  %v4072_v17 = vsel %vm708_vm0, %v1440_v49, %v1441_v51  ;;  %v1446_v18 = vrot.slane %v2222_v8, 1  ;;  %v3263_v14 = vmov 0.0   ;;  %v2241_v34 = vld [vmem:[%s4351_s3 + $0x258] sm:$0xff] }
  0x89   : > { %1303 = vmatmul.mubr.f32.gmra.mrb[18].mxu1 %v1000_v11  ;;  %2701 = vmatprep.mubr.f32.mxu0 %v1093_v29  ;;  %v1099_v11 = vsel %vm708_vm0, %v1097_v23, %v1098_v24  ;;  %v2225_v23 = vld [vmem:[%s3631_s8 + $0xb0] sm:$0x1]  ;;  %v4084_v24 = vpack.c.bf16 %v2253_v33, %v2252_v31  ;;  %v2228_v31 = vld [vmem:[%s3631_s8 + $0xe0] sm:$0xfe]  ;;  %v4112_v63 = vsel %vm708_vm0, %v1452_v42, %v1453_v43  ;;  %v2273_v42 = vld [vmem:[%s4352_s4 + $0x158] sm:$0xff] }
  0x8a   : > { %2954 = vmatpush3.bf16.msra.mxu1 %v4016_v28  ;;  %1307 = vmatprep.mubr.f32.mxu1 %v1003_v19  ;;  %v1447_v19 = vrot.slane %v2223_v9, 1  ;;  %v1450_v29 = vrot.slane %v2225_v23, 1  ;;  %v2229_v33 = vld [vmem:[%s3631_s8 + $0xf0] sm:$0x1]  ;;  %v1455_v49 = vrot.slane %v2228_v31, 1  ;;  %v1752_v9 = vrot.slane %v1700_v10, 1 }
  0x8b   : > { %2928 = vmatpush3.bf16.msra.mxu0 %v4030_v39  ;;  %2956 = vmatprep.subr.bf16.mxu1 %v4032_v40  ;;  %v1456_v51 = vrot.slane %v2229_v33, 1  ;;  %v2258_v43 = vld [vmem:[%s4351_s3 + $0x2e0] sm:$0xff]  ;;  %v2259_v31 = vld [vmem:[%s4351_s3 + $0x2e8] sm:$0xff] }
  0x8c   : > { %2702 = vmatmul.mubr.f32.gmra.mrb[4].mxu0 %v1096_v45  ;;  %2929 = vmatprep.subr.bf16.mxu0 %v3261_v2  ;;  %v4093_v41 = vsel %vm708_vm0, %v1446_v18, %v1447_v19  ;;  %v4103_v45 = vsel %vm708_vm0, %v1449_v26, %v1450_v29  ;;  %v4146_v15 = vsel %vm708_vm0, %v1751_v1, %v1752_v9  ;;  %v1006_v18 = vld [vmem:[%s3863_s29 + $0x80] sm:$0xff]  ;;  %v2240_v29 = vld [vmem:[%s4351_s3 + $0x250] sm:$0xff]  ;;  %v2275_v1 = vld [vmem:[%s4352_s4 + $0x168] sm:$0xff] }
  0x8d   : > { %1308 = vmatmul.mubr.f32.gmra.mrb[20].mxu1 %v1002_v46  ;;  %2704 = vmatprep.mubr.f32.mxu0 %v1099_v11  ;;  %v1007_v46 = vld [vmem:[%s3863_s29 + $0x88] sm:$0xff]  ;;  %v4131_v8 = vsel %vm708_vm0, %v1455_v49, %v1456_v51  ;;  %v4157_v26 = vpack.c.bf16 %v2257_v13, %v2256_v12  ;;  %v1008_v33 = vld [vmem:[%s3863_s29 + $0xa0] sm:$0xff]  ;;  %v4185_v51 = vpack.c.bf16 %v2273_v42, %v2272_v35 }
  0x8e   : > { %2958 = vmatpush3.bf16.msra.mxu1 %v4039_v47  ;;  %1312 = vmatprep.mubr.f32.mxu1 %v1005_v55  ;;  %v2238_v55 = vld [vmem:[%s4351_s3 + $0x240] sm:$0xff]  ;;  %v2271_v11 = vld [vmem:[%s4352_s4 + $0x148] sm:$0xff]  ;;  %v4187_v52 = vpack.c.bf16 %v2259_v31, %v2258_v43 }
  0x8f   : > { %2931 = vmatpush3.bf16.msra.mxu0 %v4044_v57  ;;  %2960 = vmatprep.subr.bf16.mxu1 %v4084_v24  ;;  %v4150_v19 = vpack.c.bf16 %v2239_v58, %v2238_v55  ;;  %v4155_v23 = vpack.c.bf16 %v2271_v11, %v2270_v59  ;;  %v1011_v49 = vld [vmem:[%s3863_s29 + $0xc8] sm:$0xff]  ;;  %v2274_v10 = vld [vmem:[%s4352_s4 + $0x160] sm:$0xff]  ;;  %v2260_v55 = vld [vmem:[%s4351_s3 + $0x2f0] sm:$0xff] }
  0x90   : > { %2705 = vmatmul.mubr.f32.gmra.mrb[6].mxu0 %v1102_v44  ;;  %2932 = vmatprep.subr.bf16.mxu0 %v3261_v2  ;;  %v4180_v44 = vpack.c.bf16 %v2241_v34, %v2240_v29  ;;  %v2261_v58 = vld [vmem:[%s4351_s3 + $0x2f8] sm:$0xff]  ;;  %v1010_v59 = vld [vmem:[%s3863_s29 + $0xc0] sm:$0xff]  ;;  %v1013_v11 = vld [vmem:[%s3863_s29 + $0xe8] sm:$0xff]  ;;  %v4215_v12 = vpack.c.bf16 %v2275_v1, %v2274_v10 }
  0x91   : > { %1313 = vmatmul.mubr.f32.gmra.mrb[22].mxu1 %v1004_v54  ;;  %2739 = vmatprep.mubr.msk.f32.mxu0 %vm3262_vm1, %v3263_v14  ;;  %v2242_v54 = vld [vmem:[%s4351_s3 + $0x260] sm:$0xff]  ;;  %v4217_v13 = vpack.c.bf16 %v2261_v58, %v2260_v55  ;;  %v2276_v29 = vld [vmem:[%s4352_s4 + $0x170] sm:$0xff]  ;;  %v2277_v34 = vld [vmem:[%s4352_s4 + $0x178] sm:$0xff] }
  0x92   : > { %2962 = vmatpush3.bf16.msra.mxu1 %v4108_v62  ;;  %1317 = vmatprep.mubr.f32.mxu1 %v1007_v46  ;;  %v2243_v46 = vld [vmem:[%s4351_s3 + $0x268] sm:$0xff]  ;;  %v1012_v35 = vld [vmem:[%s3863_s29 + $0xe0] sm:$0xff]  ;;  %v4238_v43 = vpack.c.bf16 %v2277_v34, %v2276_v29 }
  0x93   : > { %2934 = vmatpush3.bf16.msra.mxu0 %v4117_v27  ;;  %2964 = vmatprep.subr.bf16.mxu1 %v4119_v30  ;;  %v4210_v9 = vpack.c.bf16 %v2243_v46, %v2242_v54 }
  0x94   : > { %2935 = vmatprep.subr.bf16.mxu0 %v3261_v2 }
  0x95   : > { %1318 = vmatmul.mubr.f32.gmra.mrb[24].mxu1 %v1006_v18  ;;  %v2244_v18 = vld [vmem:[%s4351_s3 + $0x270] sm:$0xff] }
  0x96   : > { %2966 = vmatpush3.bf16.msra.mxu1 %v4150_v19  ;;  %1322 = vmatprep.mubr.f32.mxu1 %v1009_v22  ;;  %v2245_v22 = vld [vmem:[%s4351_s3 + $0x278] sm:$0xff] }
  0x97   : > { %2937 = vmatpush3.bf16.msra.mxu0 %v4155_v23  ;;  %2968 = vmatprep.subr.bf16.mxu1 %v4157_v26  ;;  %v4234_v42 = vpack.c.bf16 %v2245_v22, %v2244_v18 }
  0x98   : > { %2938 = vmatprep.subr.bf16.mxu0 %v3261_v2 }
  0x99   : > { %1323 = vmatmul.mubr.f32.gmra.mrb[26].mxu1 %v1008_v33 }
  0x9a   : > { %2970 = vmatpush3.bf16.msra.mxu1 %v4180_v44  ;;  %1327 = vmatprep.mubr.f32.mxu1 %v1011_v49 }
  0x9b   : > { %2940 = vmatpush3.bf16.msra.mxu0 %v4185_v51  ;;  %2972 = vmatprep.subr.bf16.mxu1 %v4187_v52 }
  0x9c   : > { %2941 = vmatprep.subr.bf16.mxu0 %v3261_v2 }
  0x9d   : > { %1328 = vmatmul.mubr.f32.gmra.mrb[28].mxu1 %v1010_v59 }
  0x9e   : > { %2974 = vmatpush3.bf16.msra.mxu1 %v4210_v9  ;;  %1332 = vmatprep.mubr.f32.mxu1 %v1013_v11 }
  0x9f   : > { %2943 = vmatpush3.bf16.msra.mxu0 %v4215_v12  ;;  %2976 = vmatprep.subr.bf16.mxu1 %v4217_v13 }
  0xa0   : > { %2944 = vmatprep.subr.bf16.mxu0 %v3261_v2 }
  0xa1   : > { %1333 = vmatmul.mubr.f32.gmra.mrb[30].mxu1 %v1012_v35 }
  0xa2   : > { %2978 = vmatpush3.bf16.msra.mxu1 %v4234_v42  ;;  %1646 = vmatprep.mubr.f32.mxu1 %v3716_v37  ;;  %v1698_v37 = vld [vmem:[%s4080_s15 + $0x8] sm:$0xff] }
  0xa3   : > { %2946 = vmatpush3.bf16.msra.mxu0 %v4238_v43  ;;  %3004 = vmatprep.subr.bf16.mxu1 %v3925_v36 }
  0xa4   : > { %2979 = vmatprep.subr.bf16.mxu0 %v3261_v2 }
  0xa5   : > { %1647 = vmatmul.mubr.f32.vlgmr.msra.gmra.mrb[32].mxu1 %v3739_v48  ;;  %v1697_v48 = vld [vmem:[%s4080_s15] sm:$0xff] }
  0xa6   : > { %3006 = vmatpush3.bf16.msra.mxu1 %v3960_v60  ;;  %2740 = vmatmul.mubr.f32.vlgmr.msra.gmra.mrb[8].mxu0 %v4053_v61  ;;  %v2153_v61 = vld [vmem:[%s4353_s5] ss:$0 sm:$0xff] }
  0xa7   : > { %1651 = vmatprep.mubr.f32.mxu1 %v3744_v53  ;;  %2981 = vmatpush3.bf16.msra.mxu0 %v3974_v3 }
  0xa8   : > { %3008 = vmatprep.subr.bf16.mxu1 %v3976_v7  ;;  %2742 = vmatprep.mubr.msk.f32.mxu0 %vm3262_vm1, %v3263_v14 }
  0xa9   : > { %1652 = vmatmul.mubr.f32.gmra.mrb[34].mxu1 %v3768_v0  ;;  %2982 = vmatprep.subr.bf16.mxu0 %v3261_v2 }
  0xaa   : > { %3010 = vmatpush3.bf16.msra.mxu1 %v4016_v28  ;;  %2743 = vmatmul.mubr.f32.gmra.mrb[10].mxu0 %v4072_v17 }
  0xab   : > { %1656 = vmatprep.mubr.f32.mxu1 %v3773_v5  ;;  %2984 = vmatpush3.bf16.msra.mxu0 %v4030_v39 }
  0xac   : > { %3012 = vmatprep.subr.bf16.mxu1 %v4032_v40  ;;  %2745 = vmatprep.mubr.msk.f32.mxu0 %vm3262_vm1, %v3263_v14 }
  0xad   : > { %1657 = vmatmul.mubr.f32.gmra.mrb[36].mxu1 %v3797_v16  ;;  %2985 = vmatprep.subr.bf16.mxu0 %v3261_v2 }
  0xae   : > { %3014 = vmatpush3.bf16.msra.mxu1 %v4039_v47  ;;  %2746 = vmatmul.mubr.f32.gmra.mrb[12].mxu0 %v4087_v25 }
  0xaf   : > { %1661 = vmatprep.mubr.f32.mxu1 %v3802_v21  ;;  %2987 = vmatpush3.bf16.msra.mxu0 %v4044_v57 }
  0xb0   : > { %3016 = vmatprep.subr.bf16.mxu1 %v4084_v24  ;;  %2748 = vmatprep.mubr.msk.f32.mxu0 %vm3262_vm1, %v3263_v14 }
  0xb1   : > { %1662 = vmatmul.mubr.f32.gmra.mrb[38].mxu1 %v3826_v32  ;;  %2988 = vmatprep.subr.bf16.mxu0 %v3261_v2 }
  0xb2   : > { %3018 = vmatpush3.bf16.msra.mxu1 %v4108_v62  ;;  %2749 = vmatmul.mubr.f32.gmra.mrb[14].mxu0 %v4093_v41 }
  0xb3   : > { %1666 = vmatprep.mubr.f32.mxu1 %v3831_v38  ;;  %2990 = vmatpush3.bf16.msra.mxu0 %v4117_v27 }
  0xb4   : > { %3020 = vmatprep.subr.bf16.mxu1 %v4119_v30  ;;  %2751 = vmatprep.mubr.msk.f32.mxu0 %vm3262_vm1, %v3263_v14 }
  0xb5   : > { %1667 = vmatmul.mubr.f32.gmra.mrb[40].mxu1 %v3855_v50  ;;  %2991 = vmatprep.subr.bf16.mxu0 %v3261_v2 }
  0xb6   : > { %3022 = vmatpush3.bf16.msra.mxu1 %v4150_v19  ;;  %2752 = vmatmul.mubr.f32.gmra.mrb[16].mxu0 %v4103_v45 }
  0xb7   : > { %1671 = vmatprep.mubr.f32.mxu1 %v3860_v56  ;;  %2993 = vmatpush3.bf16.msra.mxu0 %v4155_v23 }
  0xb8   : > { %3024 = vmatprep.subr.bf16.mxu1 %v4157_v26  ;;  %2754 = vmatprep.mubr.msk.f32.mxu0 %vm3262_vm1, %v3263_v14 }
  0xb9   : > { %1672 = vmatmul.mubr.f32.gmra.mrb[42].mxu1 %v3887_v4  ;;  %2994 = vmatprep.subr.bf16.mxu0 %v3261_v2 }
  0xba   : > { %3026 = vmatpush3.bf16.msra.mxu1 %v4180_v44  ;;  %2755 = vmatmul.mubr.f32.gmra.mrb[18].mxu0 %v4112_v63 }
  0xbb   : > { %1676 = vmatprep.mubr.f32.mxu1 %v3890_v6  ;;  %2996 = vmatpush3.bf16.msra.mxu0 %v4185_v51 }
  0xbc   : > { %3028 = vmatprep.subr.bf16.mxu1 %v4187_v52  ;;  %2757 = vmatprep.mubr.msk.f32.mxu0 %vm3262_vm1, %v3263_v14 }
  0xbd   : > { %1677 = vmatmul.mubr.f32.gmra.mrb[44].mxu1 %v3905_v20  ;;  %2997 = vmatprep.subr.bf16.mxu0 %v3261_v2 }
  0xbe   : > { %3030 = vmatpush3.bf16.msra.mxu1 %v4210_v9  ;;  %2758 = vmatmul.mubr.f32.gmra.mrb[20].mxu0 %v4131_v8 }
  0xbf   : > { %2999 = vmatpush3.bf16.msra.mxu0 %v4215_v12  ;;  %3032 = vmatprep.subr.bf16.mxu1 %v4217_v13 }
  0xc0   : > { %3000 = vmatprep.subr.bf16.mxu0 %v3261_v2  ;;  %1889 = vmatprep.mubr.f32.mxu1 %v1698_v37 }
  0xc1   : > { %2792 = vmatprep.mubr.msk.f32.mxu0 %vm3262_vm1, %v3263_v14 }
  0xc2   : > { %3034 = vmatpush3.bf16.msra.mxu1 %v4234_v42 }
  0xc3   : > { %3002 = vmatpush3.bf16.msra.mxu0 %v4238_v43 }
  0xc5   : > { %1890 = vmatmul.mubr.f32.vlgmr.msra.gmra.mrb[46].mxu1 %v1697_v48 }
  0xc6   : > { %2793 = vmatmul.mubr.f32.vlgmr.msra.gmra.mrb[22].mxu0 %v4146_v15 }
 0x138   : > { %v2387_v53 = vpop.f32.mrb[0].mxu1 }
 0x139   : > { %v2388_v0 = vpop.f32.mrb[1].mxu1 }
 0x13a   : > { %v2389_v5 = vadd.f32 %v2388_v0, %v2387_v53 }
 0x13c   : > { %v2390_v16 = vpop.f32.mrb[2].mxu1  ;;  %v3038_v45 = vadd.f32 %v2389_v5, %v2153_v61 }
 0x13d   : > { %v2391_v21 = vpop.f32.mrb[3].mxu1 }
 0x13e   : > { %v2392_v32 = vadd.f32 %v2391_v21, %v2390_v16 }
 0x140   : > { %v2393_v38 = vpop.f32.mrb[4].mxu1  ;;  %v3035_v25 = vadd.f32 %v2392_v32, %v2153_v61 }
 0x141   : > { %v2394_v50 = vpop.f32.mrb[5].mxu1 }
 0x142   : > { %v2395_v56 = vadd.f32 %v2394_v50, %v2393_v38 }
 0x144   : > { %v2396_v4 = vpop.f32.mrb[6].mxu1  ;;  %v3044_v23 = vadd.f32 %v2395_v56, %v2153_v61 }
 0x145   : > { %v2397_v6 = vpop.f32.mrb[7].mxu1 }
 0x146   : > { %v2398_v20 = vadd.f32 %v2397_v6, %v2396_v4 }
 0x148   : > { %v2399_v36 = vpop.f32.mrb[8].mxu1  ;;  %v3041_v15 = vadd.f32 %v2398_v20, %v2153_v61 }
 0x149   : > { %v2400_v60 = vpop.f32.mrb[9].mxu1 }
 0x14a   : > { %v2401_v2 = vadd.f32 %v2400_v60, %v2399_v36 }
 0x14c   : > { %v2402_v3 = vpop.f32.mrb[10].mxu1  ;;  %v3050_v10 = vadd.f32 %v2401_v2, %v2153_v61 }
 0x14d   : > { %v2403_v7 = vpop.f32.mrb[11].mxu1 }
 0x14e   : > { %v2404_v28 = vadd.f32 %v2403_v7, %v2402_v3 }
 0x150   : > { %v2405_v39 = vpop.f32.mrb[12].mxu1  ;;  %v3047_v54 = vadd.f32 %v2404_v28, %v2153_v61 }
 0x151   : > { %v2406_v40 = vpop.f32.mrb[13].mxu1 }
 0x152   : > { %v2407_v47 = vadd.f32 %v2406_v40, %v2405_v39 }
 0x154   : > { %v2408_v57 = vpop.f32.mrb[14].mxu1  ;;  %v3056_v22 = vadd.f32 %v2407_v47, %v2153_v61 }
 0x155   : > { %v2409_v17 = vpop.f32.mrb[15].mxu1 }
 0x156   : > { %v2410_v24 = vadd.f32 %v2409_v17, %v2408_v57 }
 0x157   : > { %v2697_v41 = vpop.f32.mrb[0].mxu0 }
 0x158   : > { %v3036_v62 = vadd.f32 %v3035_v25, %v2697_v41  ;;  %v2467_v63 = vpop.f32.mrb[16].mxu1  ;;  %v1194_v27 = vpop.f32.mrb[1].mxu0  ;;  %v3053_v13 = vadd.f32 %v2410_v24, %v2153_v61 }
 0x159   : > { %v3039_v30 = vadd.f32 %v3038_v45, %v1194_v27  ;;  %v2468_v8 = vpop.f32.mrb[17].mxu1 }
 0x15a   : > { %v2469_v14 = vadd.f32 %v2468_v8, %v2467_v63 }
 0x15b   : > { %v2700_v19 = vpop.f32.mrb[2].mxu0 }
 0x15c   : > { %v3040_v26 = vadd.f32 %v3039_v30, %v2469_v14  ;;  %v3042_v31 = vadd.f32 %v3041_v15, %v2700_v19  ;;  %v2470_v33 = vpop.f32.mrb[18].mxu1  ;;  %v1204_v44 = vpop.f32.mrb[3].mxu0 }
 0x15d   : > { %v3045_v49 = vadd.f32 %v3044_v23, %v1204_v44  ;;  %v2471_v51 = vpop.f32.mrb[19].mxu1 }
 0x15e   : > { %v2472_v52 = vadd.f32 %v2471_v51, %v2470_v33 }
 0x15f   : > { %v2703_v46 = vpop.f32.mrb[4].mxu0 }
 0x160   : > { %v3037_v1 = vadd.f32 %v3036_v62, %v2472_v52  ;;  %v3048_v55 = vadd.f32 %v3047_v54, %v2703_v46  ;;  %v2473_v58 = vpop.f32.mrb[20].mxu1  ;;  %v1214_v59 = vpop.f32.mrb[5].mxu0 }
 0x161   : > { %v3051_v9 = vadd.f32 %v3050_v10, %v1214_v59  ;;  %v2474_v11 = vpop.f32.mrb[21].mxu1 }
 0x162   : > { %v2475_v12 = vadd.f32 %v2474_v11, %v2473_v58 }
 0x163   : > { %v2706_v18 = vpop.f32.mrb[6].mxu0 }
 0x164   : > { %v3046_v29 = vadd.f32 %v3045_v49, %v2475_v12  ;;  %v3054_v34 = vadd.f32 %v3053_v13, %v2706_v18  ;;  %v2476_v35 = vpop.f32.mrb[22].mxu1  ;;  %v1224_v42 = vpop.f32.mrb[7].mxu0 }
 0x165   : > { %v3057_v43 = vadd.f32 %v3056_v22, %v1224_v42  ;;  %v2477_v37 = vpop.f32.mrb[23].mxu1 }
 0x166   : > { %v2478_v48 = vadd.f32 %v2477_v37, %v2476_v35 }
 0x168   : > { %v3043_v53 = vadd.f32 %v3042_v31, %v2478_v48  ;;  %v2479_v0 = vpop.f32.mrb[24].mxu1 }
 0x169   : > { %v2480_v5 = vpop.f32.mrb[25].mxu1 }
 0x16a   : > { %v2481_v16 = vadd.f32 %v2480_v5, %v2479_v0 }
 0x16c   : > { %v3052_v21 = vadd.f32 %v3051_v9, %v2481_v16  ;;  %v2482_v32 = vpop.f32.mrb[26].mxu1 }
 0x16d   : > { %v2483_v38 = vpop.f32.mrb[27].mxu1 }
 0x16e   : > { %v2484_v50 = vadd.f32 %v2483_v38, %v2482_v32 }
 0x170   : > { %v3049_v56 = vadd.f32 %v3048_v55, %v2484_v50  ;;  %v2485_v4 = vpop.f32.mrb[28].mxu1 }
 0x171   : > { %v2486_v6 = vpop.f32.mrb[29].mxu1 }
 0x172   : > { %v2487_v20 = vadd.f32 %v2486_v6, %v2485_v4 }
 0x174   : > { %v3058_v36 = vadd.f32 %v3057_v43, %v2487_v20  ;;  %v2488_v60 = vpop.f32.mrb[30].mxu1 }
 0x175   : > { %v2489_v2 = vpop.f32.mrb[31].mxu1 }
 0x176   : > { %v2490_v3 = vadd.f32 %v2489_v2, %v2488_v60 }
 0x178   : > { %v4316_v7 = vadd.f32 %v3054_v34, %v2490_v3  ;;  %v2546_v28 = vpop.f32.mrb[32].mxu1 }
 0x179   : > { %v2547_v39 = vpop.f32.mrb[33].mxu1  ;;  %v1548_v40 = vpop.f32.mrb[8].mxu0 }
 0x17a   : > { %v2548_v47 = vadd.f32 %v2547_v39, %v2546_v28  ;;  %v2741_v57 = vpop.f32.mrb[9].mxu0 }
 0x17c   : > { %v1649_v61 = vadd.f32 %v2548_v47, %v1548_v40  ;;  %v2549_v17 = vpop.f32.mrb[34].mxu1 }
 0x17d   : > { %v2550_v24 = vpop.f32.mrb[35].mxu1  ;;  %v1553_v25 = vpop.f32.mrb[10].mxu0 }
 0x17e   : > { %v1682_v41 = vadd.f32 %v3040_v26, %v1649_v61  ;;  %v2551_v45 = vadd.f32 %v2550_v24, %v2549_v17  ;;  %v2744_v62 = vpop.f32.mrb[11].mxu0 }
 0x180   : > { %1905 = vst [vmem:[%s4322_s14] sm:$0xff] %v1682_v41  ;;  %v1654_v63 = vadd.f32 %v2551_v45, %v1553_v25  ;;  %v2552_v27 = vpop.f32.mrb[36].mxu1 }
 0x181   : > { %v2553_v30 = vpop.f32.mrb[37].mxu1  ;;  %v1558_v8 = vpop.f32.mrb[12].mxu0 }
 0x182   : > { %v1683_v14 = vadd.f32 %v3037_v1, %v1654_v63  ;;  %v2554_v15 = vadd.f32 %v2553_v30, %v2552_v27  ;;  %v2747_v19 = vpop.f32.mrb[13].mxu0 }
 0x184   : > { %1906 = vst [vmem:[%s4322_s14 + $0x8] sm:$0xff] %v1683_v14  ;;  %v1659_v23 = vadd.f32 %v2554_v15, %v1558_v8  ;;  %v2555_v31 = vpop.f32.mrb[38].mxu1 }
 0x185   : > { %v2556_v33 = vpop.f32.mrb[39].mxu1  ;;  %v1563_v44 = vpop.f32.mrb[14].mxu0 }
 0x186   : > { %v1684_v49 = vadd.f32 %v3046_v29, %v1659_v23  ;;  %v2557_v51 = vadd.f32 %v2556_v33, %v2555_v31  ;;  %v2750_v26 = vpop.f32.mrb[15].mxu0 }
 0x188   : > { %1907 = vst [vmem:[%s4322_s14 + $0x10] sm:$0xff] %v1684_v49  ;;  %v1664_v52 = vadd.f32 %v2557_v51, %v1563_v44  ;;  %v2558_v54 = vpop.f32.mrb[40].mxu1 }
 0x189   : > { %v2559_v46 = vpop.f32.mrb[41].mxu1  ;;  %v1568_v10 = vpop.f32.mrb[16].mxu0 }
 0x18a   : > { %v1685_v55 = vadd.f32 %v3043_v53, %v1664_v52  ;;  %v2560_v58 = vadd.f32 %v2559_v46, %v2558_v54  ;;  %v2753_v1 = vpop.f32.mrb[17].mxu0 }
 0x18c   : > { %1908 = vst [vmem:[%s4322_s14 + $0x18] sm:$0xff] %v1685_v55  ;;  %v1669_v59 = vadd.f32 %v2560_v58, %v1568_v10  ;;  %v2561_v9 = vpop.f32.mrb[42].mxu1 }
 0x18d   : > { %v2562_v11 = vpop.f32.mrb[43].mxu1  ;;  %v1573_v12 = vpop.f32.mrb[18].mxu0 }
 0x18e   : > { %v1686_v13 = vadd.f32 %v3052_v21, %v1669_v59  ;;  %v2563_v18 = vadd.f32 %v2562_v11, %v2561_v9  ;;  %v2756_v22 = vpop.f32.mrb[19].mxu0 }
 0x190   : > { %1909 = vst [vmem:[%s4322_s14 + $0x20] sm:$0xff] %v1686_v13  ;;  %v1674_v29 = vadd.f32 %v2563_v18, %v1573_v12  ;;  %v2564_v34 = vpop.f32.mrb[44].mxu1 }
 0x191   : > { %v2565_v35 = vpop.f32.mrb[45].mxu1  ;;  %v1578_v42 = vpop.f32.mrb[20].mxu0 }
 0x192   : > { %v1687_v43 = vadd.f32 %v3049_v56, %v1674_v29  ;;  %v2566_v37 = vadd.f32 %v2565_v35, %v2564_v34  ;;  %v2759_v48 = vpop.f32.mrb[21].mxu0 }
 0x194   : > { %1910 = vst [vmem:[%s4322_s14 + $0x28] sm:$0xff] %v1687_v43  ;;  %v1679_v53 = vadd.f32 %v2566_v37, %v1578_v42 }
 0x196   : > { %v1688_v0 = vadd.f32 %v3058_v36, %v1679_v53 }
 0x198   : > { %1911 = vst [vmem:[%s4322_s14 + $0x30] sm:$0xff] %v1688_v0  ;;  %v2616_v5 = vpop.f32.mrb[46].mxu1 }
 0x199   : > { %v2617_v16 = vpop.f32.mrb[47].mxu1  ;;  %v1821_v32 = vpop.f32.mrb[22].mxu0 }
 0x19a   : > { %v2618_v38 = vadd.f32 %v2617_v16, %v2616_v5  ;;  %v2794_v21 = vpop.f32.mrb[23].mxu0 }
 0x19c   : > { %v1892_v50 = vadd.f32 %v2618_v38, %v1821_v32 }
 0x19e   : > { %v1895_v4 = vadd.f32 %v4316_v7, %v1892_v50 }
 0x1a0   : > { %1912 = vst [vmem:[%s4322_s14 + $0x38] sm:$0xff] %v1895_v4 }
 0x1a1 PF: > { %s16_s25 = sadd.s32 1, %s3247_s25   ;;  %s4358_s21 = smov %s3235_s22 }
 0x1a2   : > { %p13_p12 = scmp.ge.s32.totalorder %s16_s25, 4   ;;  %s4359_s22 = smov %s3338_s30 }
 0x1a3   : > { %s4360_s23 = smov %s3243_s24  ;;  %s4361_s24 = smov %s4363_s26 }
 0x1a4   :  { %15 = sbr.rel (!%p13_p12) target bundleno = 3 (0x3), region = 203 }

</bundles_post_ra>
